<compile_context>
chip_gen: v6e
topology: v6e:2x2x1
jax: 0.10.0
libtpu: 0.0.40
codegen_flags: <defaults>
</compile_context>

<pallas_src>
import math

import jax
import jax.numpy as jnp
import numpy as np
from jax import lax
from jax.experimental import pallas as pl
from jax.experimental.pallas import tpu as pltpu

# ----- small synthetic BERT config (args.n_bert_hid=32, args.n_cls=4) --------
B, S, H = 2, 8, 32          # batch, seq len, hidden
N_HEADS, HEAD_DIM = 4, 8    # H = N_HEADS * HEAD_DIM
INTER = 64                  # FFN intermediate size
L = 2                       # number of encoder layers
VOCAB = 50                  # vocab size (token id 0 == padding)
N_CLS = 4                   # number of classes
LANE = 128                  # lane-dense output width (>= N_CLS)


def _layernorm(x, g, b, eps=1e-12):
    # Two independent reduces (mean(x) and mean(x*x)) instead of the serial
    # mean -> (x - mu)^2 -> mean chain; they can overlap in the XLU.
    mu = jnp.mean(x, axis=-1, keepdims=True)
    var = jnp.maximum(jnp.mean(x * x, axis=-1, keepdims=True) - mu * mu, 0.0)
    return (x - mu) * lax.rsqrt(var + eps) * g + b


def _gelu(x):
    # TODO(synk): HF BERT uses exact erf-GELU; tanh approximation used here.
    c = math.sqrt(2.0 / math.pi)
    return 0.5 * x * (1.0 + jnp.tanh(c * (x + 0.044715 * x * x * x)))


# ------------------------------- Pallas kernel -------------------------------
def bert_mlp_kernel(mask_ref, emb_ref, embln_ref, wqkv_ref, bqkv_ref, wo_ref,
                    lnv_ref, wi_ref, bi_ref, wo2_ref, wfc_ref, bfc_ref, out_ref):
    embln = embln_ref[...]                                 # (2, H)
    h = _layernorm(emb_ref[...], embln[0:1], embln[1:2])   # (BS, H)
    mask = mask_ref[...]                                   # (1, BS, BS) additive

    for l in range(L):                                     # static unroll over layers
        lv = lnv_ref[l]                                    # (6, H): bo, ln1_g, ln1_b, bo2, ln2_g, ln2_b

        # Fused QKV: one (BS, H) x (H, 3H) matmul (96 output lanes); the 1/sqrt(HD)
        # scale is folded into the Q columns/bias in the wrapper.
        qkv = jnp.dot(h, wqkv_ref[l],
                      preferred_element_type=jnp.float32) + bqkv_ref[l]   # (BS, 3H)

        # Per-head q/k/v as static lane slices (multiples of HEAD_DIM), stacked on a
        # leading head axis for the batched attention dots.
        q = jnp.stack([qkv[:, n * HEAD_DIM:(n + 1) * HEAD_DIM]
                       for n in range(N_HEADS)])                          # (NH, BS, HD)
        k = jnp.stack([qkv[:, H + n * HEAD_DIM:H + (n + 1) * HEAD_DIM]
                       for n in range(N_HEADS)])                          # (NH, BS, HD)
        v = jnp.stack([qkv[:, 2 * H + n * HEAD_DIM:2 * H + (n + 1) * HEAD_DIM]
                       for n in range(N_HEADS)])                          # (NH, BS, HD)

        # Attention, batched over heads.
        s = lax.dot_general(q, k, (((2,), (2,)), ((0,), (0,))),
                            preferred_element_type=jnp.float32)           # (NH, BS, BS)
        s = s + mask                                        # masks padded keys AND cross-batch pairs
        s = s - jnp.max(s, axis=-1, keepdims=True)
        prob = jnp.exp(s)
        prob = prob * pl.reciprocal(jnp.sum(prob, axis=-1, keepdims=True), approx=True)
        ctx = lax.dot_general(prob, v, (((2,), (1,)), ((0,), (0,))),
                              preferred_element_type=jnp.float32)          # (NH, BS, HD)

        # Output projection: Wo repacked per head as (NH, HD, H) so the contraction
        # is over the RHS sublane dim (no transposed-RHS relayout); sum over heads
        # == concat(ctx) @ Wo.
        attn = lax.dot_general(ctx, wo_ref[l], (((2,), (1,)), ((0,), (0,))),
                               preferred_element_type=jnp.float32)         # (NH, BS, H)
        attn = jnp.sum(attn, axis=0) + lv[0:1]                             # (BS, H)
        h = _layernorm(h + attn, lv[1:2], lv[2:3])

        # Feed-forward: weights already laid out (K on sublanes, N on lanes).
        inter = _gelu(jnp.dot(h, wi_ref[l],
                              preferred_element_type=jnp.float32) + bi_ref[l])   # (BS, INTER)
        ffn = jnp.dot(inter, wo2_ref[l],
                      preferred_element_type=jnp.float32) + lv[3:4]               # (BS, H)
        h = _layernorm(h + ffn, lv[4:5], lv[5:6])

    # Lane-dense (128-wide) classifier output for all positions; wrapper slices.
    out_ref[...] = jnp.dot(h, wfc_ref[...],
                           preferred_element_type=jnp.float32) + bfc_ref[...]


# ----------------------- wrapper-side operand packing --------------------------
def _pack_params(p):
    scale = 1.0 / math.sqrt(HEAD_DIM)

    # Fused QKV weight/bias; scale folded into the Q slice.
    w_qkv = jnp.concatenate([p["wq"] * scale, p["wk"], p["wv"]], axis=-1)   # (L, H, 3H)
    b_qkv = jnp.concatenate([p["bq"] * scale, p["bk"], p["bv"]], axis=-1)   # (L, 1, 3H)

    # Attention output projection per head: (L, NH, HD, H); contraction over HD
    # (sublane dim), no transpose needed in the kernel.
    w_o = p["wo"].reshape(L, N_HEADS, HEAD_DIM, H)                          # (L, NH, HD, H)

    # Per-layer LN / bias vectors: bo, ln1_g, ln1_b, bo2, ln2_g, ln2_b.
    ln_vecs = jnp.concatenate([p["bo"], p["ln1_g"], p["ln1_b"],
                               p["bo2"], p["ln2_g"], p["ln2_b"]], axis=1)   # (L, 6, H)

    emb_ln = jnp.concatenate([p["emb_ln_g"], p["emb_ln_b"]], axis=0)        # (2, H)
    wfc_pad = jnp.zeros((H, LANE), jnp.float32).at[:, :N_CLS].set(p["wfc"])
    bfc_pad = jnp.zeros((1, LANE), jnp.float32).at[:, :N_CLS].set(p["bfc"])

    # FFN weights passed un-stacked and un-transposed: wi (L, H, INTER),
    # wo2 (L, INTER, H) — MXU-friendly layout for both matmuls.
    return (emb_ln, w_qkv, b_qkv, w_o, ln_vecs,
            p["wi"], p["bi"], p["wo2"], wfc_pad, bfc_pad)


# -------------------------------- JAX wrapper ---------------------------------
def bert_mlp_forward(x, p):
    BS = B * S
    # Embedding gather + attention-mask construction: plain-JAX glue.
    emb = (p["word_emb"][x]
           + p["pos_emb"][None, :S, :]
           + p["type_emb"][0][None, None, :]).astype(jnp.float32)          # (B, S, H)
    emb = emb.reshape(BS, H)

    ids = x.reshape(BS)
    row_batch = jnp.arange(BS, dtype=jnp.int32) // S
    same_batch = row_batch[:, None] == row_batch[None, :]
    key_ok = (ids != 0)[None, :]
    mask_add = jnp.where(same_batch & key_ok, 0.0, -1e9).astype(jnp.float32)[None]  # (1, BS, BS)

    packed = _pack_params(p)

    vmem = pl.BlockSpec(memory_space=pltpu.MemorySpace.VMEM)
    out = pl.pallas_call(
        bert_mlp_kernel,
        out_shape=jax.ShapeDtypeStruct((BS, LANE), jnp.float32),
        in_specs=[vmem] * (2 + len(packed)),
        out_specs=vmem,
    )(mask_add, emb, *packed)
    return out.reshape(B, S, LANE)[:, 0, :N_CLS]                            # (B, N_CLS)


# ------------------------- deterministic parameter init -----------------------
def init_params(key):
    ks = iter(jax.random.split(key, 16))
    std = 0.02

    def nrm(shape):
        return jax.random.normal(next(ks), shape, jnp.float32) * std

    return dict(
        word_emb=nrm((VOCAB, H)), pos_emb=nrm((S, H)), type_emb=nrm((2, H)),
        emb_ln_g=jnp.ones((1, H), jnp.float32), emb_ln_b=jnp.zeros((1, H), jnp.float32),
        wq=nrm((L, H, H)), bq=jnp.zeros((L, 1, H), jnp.float32),
        wk=nrm((L, H, H)), bk=jnp.zeros((L, 1, H), jnp.float32),
        wv=nrm((L, H, H)), bv=jnp.zeros((L, 1, H), jnp.float32),
        wo=nrm((L, H, H)), bo=jnp.zeros((L, 1, H), jnp.float32),
        ln1_g=jnp.ones((L, 1, H), jnp.float32), ln1_b=jnp.zeros((L, 1, H), jnp.float32),
        wi=nrm((L, H, INTER)), bi=jnp.zeros((L, 1, INTER), jnp.float32),
        wo2=nrm((L, INTER, H)), bo2=jnp.zeros((L, 1, H), jnp.float32),
        ln2_g=jnp.ones((L, 1, H), jnp.float32), ln2_b=jnp.zeros((L, 1, H), jnp.float32),
        wfc=nrm((H, N_CLS)), bfc=jnp.zeros((1, N_CLS), jnp.float32),
    )


# --------------------------- pure-JAX reference --------------------------------
def _ln_ref(x, g, b, eps=1e-12):
    mu = jnp.mean(x, axis=-1, keepdims=True)
    var = jnp.mean((x - mu) ** 2, axis=-1, keepdims=True)
    return (x - mu) * lax.rsqrt(var + eps) * g + b


def reference(x, p):
    emb = p["word_emb"][x] + p["pos_emb"][None, :S, :] + p["type_emb"][0][None, None, :]
    mask = (x != 0).astype(jnp.float32)
    negm = (1.0 - mask) * -1e9
    scale = 1.0 / math.sqrt(HEAD_DIM)
    outs = []
    for b in range(B):
        h = _ln_ref(emb[b], p["emb_ln_g"], p["emb_ln_b"])
        nm = negm[b][None, :]
        for l in range(L):
            q = h @ p["wq"][l] + p["bq"][l]
            k = h @ p["wk"][l] + p["bk"][l]
            v = h @ p["wv"][l] + p["bv"][l]
            ctx = []
            for hd in range(N_HEADS):
                sl = slice(hd * HEAD_DIM, (hd + 1) * HEAD_DIM)
                s = q[:, sl] @ k[:, sl].T * scale + nm
                ctx.append(jax.nn.softmax(s, axis=-1) @ v[:, sl])
            ctx = jnp.concatenate(ctx, axis=-1)
            h = _ln_ref(h + ctx @ p["wo"][l] + p["bo"][l], p["ln1_g"][l], p["ln1_b"][l])
            inter = _gelu(h @ p["wi"][l] + p["bi"][l])
            h = _ln_ref(h + inter @ p["wo2"][l] + p["bo2"][l], p["ln2_g"][l], p["ln2_b"][l])
        outs.append(h[0:1, :] @ p["wfc"] + p["bfc"])
    return jnp.concatenate(outs, axis=0)


if __name__ == "__main__":
    key = jax.random.PRNGKey(0)
    pkey, xkey = jax.random.split(key)
    params = init_params(pkey)

    # token ids; 0 is the padding id -> mask = (x != 0)
    x = jax.random.randint(xkey, (B, S), 1, VOCAB, dtype=jnp.int32)
    x = x.at[1, 6:].set(0)   # add some padding to exercise the attention mask

    logits = jax.block_until_ready(bert_mlp_forward(x, params))
    ref = reference(x, params)

    assert logits.shape == (B, N_CLS)
    assert np.allclose(np.asarray(logits), np.asarray(ref), rtol=1e-2, atol=1e-2)
    print("KERNEL_OK")
</pallas_src>

<mosaic_0001>
module attributes {stable_mosaic.version = 11 : i64} {
  func.func @bert_mlp_kernel(%arg0: memref<1x16x16xf32, #tpu.memory_space<vmem>>, %arg1: memref<16x32xf32, #tpu.memory_space<vmem>>, %arg2: memref<2x32xf32, #tpu.memory_space<vmem>>, %arg3: memref<2x32x96xf32, #tpu.memory_space<vmem>>, %arg4: memref<2x1x96xf32, #tpu.memory_space<vmem>>, %arg5: memref<2x4x8x32xf32, #tpu.memory_space<vmem>>, %arg6: memref<2x6x32xf32, #tpu.memory_space<vmem>>, %arg7: memref<2x32x64xf32, #tpu.memory_space<vmem>>, %arg8: memref<2x1x64xf32, #tpu.memory_space<vmem>>, %arg9: memref<2x64x32xf32, #tpu.memory_space<vmem>>, %arg10: memref<32x128xf32, #tpu.memory_space<vmem>>, %arg11: memref<1x128xf32, #tpu.memory_space<vmem>>, %arg12: memref<16x128xf32, #tpu.memory_space<vmem>>) attributes {dimension_semantics = [], scalar_prefetch = 0 : i64, scratch_operands = 0 : i64, tpu.core_type = #tpu.core_type<tc>} {
    %c0 = arith.constant 0 : index
    %c0_0 = arith.constant 0 : index
    %0 = vector.load %arg2[%c0, %c0_0] : memref<2x32xf32, #tpu.memory_space<vmem>>, vector<2x32xf32>
    %c0_1 = arith.constant 0 : index
    %c0_2 = arith.constant 0 : index
    %1 = vector.load %arg1[%c0_1, %c0_2] : memref<16x32xf32, #tpu.memory_space<vmem>>, vector<16x32xf32>
    %2 = vector.extract_strided_slice %0 {offsets = [0, 0], sizes = [1, 32], strides = [1, 1]} : vector<2x32xf32> to vector<1x32xf32>
    %3 = vector.extract_strided_slice %0 {offsets = [1, 0], sizes = [1, 32], strides = [1, 1]} : vector<2x32xf32> to vector<1x32xf32>
    %cst = arith.constant dense<0.000000e+00> : vector<16xf32>
    %4 = vector.multi_reduction <add>, %1, %cst [1] : vector<16x32xf32> to vector<16xf32>
    %5 = vector.shape_cast %4 : vector<16xf32> to vector<16x1xf32>
    %cst_3 = arith.constant 3.200000e+01 : f32
    %6 = vector.broadcast %cst_3 : f32 to vector<16x1xf32>
    %7 = arith.divf %5, %6 : vector<16x1xf32>
    %8 = arith.mulf %1, %1 : vector<16x32xf32>
    %cst_4 = arith.constant dense<0.000000e+00> : vector<16xf32>
    %9 = vector.multi_reduction <add>, %8, %cst_4 [1] : vector<16x32xf32> to vector<16xf32>
    %10 = vector.shape_cast %9 : vector<16xf32> to vector<16x1xf32>
    %cst_5 = arith.constant 3.200000e+01 : f32
    %11 = vector.broadcast %cst_5 : f32 to vector<16x1xf32>
    %12 = arith.divf %10, %11 : vector<16x1xf32>
    %13 = arith.mulf %7, %7 : vector<16x1xf32>
    %14 = arith.subf %12, %13 : vector<16x1xf32>
    %cst_6 = arith.constant 0.000000e+00 : f32
    %15 = vector.broadcast %cst_6 : f32 to vector<16x1xf32>
    %16 = arith.maximumf %14, %15 : vector<16x1xf32>
    %17 = vector.broadcast %7 : vector<16x1xf32> to vector<16x32xf32>
    %18 = arith.subf %1, %17 : vector<16x32xf32>
    %cst_7 = arith.constant 9.99999996E-13 : f32
    %19 = vector.broadcast %cst_7 : f32 to vector<16x1xf32>
    %20 = arith.addf %16, %19 : vector<16x1xf32>
    %21 = math.rsqrt %20 : vector<16x1xf32>
    %22 = vector.broadcast %21 : vector<16x1xf32> to vector<16x32xf32>
    %23 = arith.mulf %18, %22 : vector<16x32xf32>
    %24 = vector.broadcast %2 : vector<1x32xf32> to vector<16x32xf32>
    %25 = arith.mulf %23, %24 : vector<16x32xf32>
    %26 = vector.broadcast %3 : vector<1x32xf32> to vector<16x32xf32>
    %27 = arith.addf %25, %26 : vector<16x32xf32>
    %c0_8 = arith.constant 0 : index
    %c0_9 = arith.constant 0 : index
    %c0_10 = arith.constant 0 : index
    %28 = vector.load %arg0[%c0_8, %c0_9, %c0_10] : memref<1x16x16xf32, #tpu.memory_space<vmem>>, vector<1x16x16xf32>
    %c0_11 = arith.constant 0 : index
    %c0_12 = arith.constant 0 : index
    %c0_13 = arith.constant 0 : index
    %29 = vector.load %arg6[%c0_11, %c0_12, %c0_13] : memref<2x6x32xf32, #tpu.memory_space<vmem>>, vector<1x6x32xf32>
    %30 = vector.shape_cast %29 : vector<1x6x32xf32> to vector<6x32xf32>
    %c0_14 = arith.constant 0 : index
    %c0_15 = arith.constant 0 : index
    %c0_16 = arith.constant 0 : index
    %31 = vector.load %arg3[%c0_14, %c0_15, %c0_16] : memref<2x32x96xf32, #tpu.memory_space<vmem>>, vector<1x32x96xf32>
    %32 = vector.shape_cast %31 : vector<1x32x96xf32> to vector<32x96xf32>
    %cst_17 = arith.constant dense<0.000000e+00> : vector<16x96xf32>
    %33 = tpu.matmul %27, %32, %cst_17 {dimension_numbers = #tpu.dot_dimension_numbers<[1], [0], [0], [1], [0, 0, 1, 1], [], []>} : vector<16x32xf32>, vector<32x96xf32>, vector<16x96xf32> -> vector<16x96xf32>
    %c0_18 = arith.constant 0 : index
    %c0_19 = arith.constant 0 : index
    %c0_20 = arith.constant 0 : index
    %34 = vector.load %arg4[%c0_18, %c0_19, %c0_20] : memref<2x1x96xf32, #tpu.memory_space<vmem>>, vector<1x1x96xf32>
    %35 = vector.shape_cast %34 : vector<1x1x96xf32> to vector<1x96xf32>
    %36 = vector.broadcast %35 : vector<1x96xf32> to vector<16x96xf32>
    %37 = arith.addf %33, %36 : vector<16x96xf32>
    %38 = vector.extract_strided_slice %37 {offsets = [0, 0], sizes = [16, 8], strides = [1, 1]} : vector<16x96xf32> to vector<16x8xf32>
    %39 = vector.extract_strided_slice %37 {offsets = [0, 8], sizes = [16, 8], strides = [1, 1]} : vector<16x96xf32> to vector<16x8xf32>
    %40 = vector.extract_strided_slice %37 {offsets = [0, 16], sizes = [16, 8], strides = [1, 1]} : vector<16x96xf32> to vector<16x8xf32>
    %41 = vector.extract_strided_slice %37 {offsets = [0, 24], sizes = [16, 8], strides = [1, 1]} : vector<16x96xf32> to vector<16x8xf32>
    %42 = vector.shape_cast %38 : vector<16x8xf32> to vector<1x16x8xf32>
    %43 = vector.shape_cast %39 : vector<16x8xf32> to vector<1x16x8xf32>
    %44 = vector.shape_cast %40 : vector<16x8xf32> to vector<1x16x8xf32>
    %45 = vector.shape_cast %41 : vector<16x8xf32> to vector<1x16x8xf32>
    %46 = tpu.concatenate %42, %43, %44, %45 in 0 : vector<1x16x8xf32>, vector<1x16x8xf32>, vector<1x16x8xf32>, vector<1x16x8xf32> -> vector<4x16x8xf32>
    %47 = vector.extract_strided_slice %37 {offsets = [0, 32], sizes = [16, 8], strides = [1, 1]} : vector<16x96xf32> to vector<16x8xf32>
    %48 = vector.extract_strided_slice %37 {offsets = [0, 40], sizes = [16, 8], strides = [1, 1]} : vector<16x96xf32> to vector<16x8xf32>
    %49 = vector.extract_strided_slice %37 {offsets = [0, 48], sizes = [16, 8], strides = [1, 1]} : vector<16x96xf32> to vector<16x8xf32>
    %50 = vector.extract_strided_slice %37 {offsets = [0, 56], sizes = [16, 8], strides = [1, 1]} : vector<16x96xf32> to vector<16x8xf32>
    %51 = vector.shape_cast %47 : vector<16x8xf32> to vector<1x16x8xf32>
    %52 = vector.shape_cast %48 : vector<16x8xf32> to vector<1x16x8xf32>
    %53 = vector.shape_cast %49 : vector<16x8xf32> to vector<1x16x8xf32>
    %54 = vector.shape_cast %50 : vector<16x8xf32> to vector<1x16x8xf32>
    %55 = tpu.concatenate %51, %52, %53, %54 in 0 : vector<1x16x8xf32>, vector<1x16x8xf32>, vector<1x16x8xf32>, vector<1x16x8xf32> -> vector<4x16x8xf32>
    %56 = vector.extract_strided_slice %37 {offsets = [0, 64], sizes = [16, 8], strides = [1, 1]} : vector<16x96xf32> to vector<16x8xf32>
    %57 = vector.extract_strided_slice %37 {offsets = [0, 72], sizes = [16, 8], strides = [1, 1]} : vector<16x96xf32> to vector<16x8xf32>
    %58 = vector.extract_strided_slice %37 {offsets = [0, 80], sizes = [16, 8], strides = [1, 1]} : vector<16x96xf32> to vector<16x8xf32>
    %59 = vector.extract_strided_slice %37 {offsets = [0, 88], sizes = [16, 8], strides = [1, 1]} : vector<16x96xf32> to vector<16x8xf32>
    %60 = vector.shape_cast %56 : vector<16x8xf32> to vector<1x16x8xf32>
    %61 = vector.shape_cast %57 : vector<16x8xf32> to vector<1x16x8xf32>
    %62 = vector.shape_cast %58 : vector<16x8xf32> to vector<1x16x8xf32>
    %63 = vector.shape_cast %59 : vector<16x8xf32> to vector<1x16x8xf32>
    %64 = tpu.concatenate %60, %61, %62, %63 in 0 : vector<1x16x8xf32>, vector<1x16x8xf32>, vector<1x16x8xf32>, vector<1x16x8xf32> -> vector<4x16x8xf32>
    %cst_21 = arith.constant dense<0.000000e+00> : vector<4x16x16xf32>
    %65 = tpu.matmul %46, %55, %cst_21 {dimension_numbers = #tpu.dot_dimension_numbers<[2], [2], [1], [1], [0, 0, 0, 1, 1, 1], [0], [0]>} : vector<4x16x8xf32>, vector<4x16x8xf32>, vector<4x16x16xf32> -> vector<4x16x16xf32>
    %66 = vector.broadcast %28 : vector<1x16x16xf32> to vector<4x16x16xf32>
    %67 = arith.addf %65, %66 : vector<4x16x16xf32>
    %cst_22 = arith.constant dense<0xFF800000> : vector<4x16xf32>
    %68 = vector.multi_reduction <maximumf>, %67, %cst_22 [2] : vector<4x16x16xf32> to vector<4x16xf32>
    %69 = vector.shape_cast %68 : vector<4x16xf32> to vector<4x16x1xf32>
    %70 = vector.broadcast %69 : vector<4x16x1xf32> to vector<4x16x16xf32>
    %71 = arith.subf %67, %70 : vector<4x16x16xf32>
    %72 = math.exp %71 : vector<4x16x16xf32>
    %cst_23 = arith.constant dense<0.000000e+00> : vector<4x16xf32>
    %73 = vector.multi_reduction <add>, %72, %cst_23 [2] : vector<4x16x16xf32> to vector<4x16xf32>
    %74 = vector.shape_cast %73 : vector<4x16xf32> to vector<4x16x1xf32>
    %75 = tpu.reciprocal %74 {approx = true} : vector<4x16x1xf32> -> vector<4x16x1xf32>
    %76 = vector.broadcast %75 : vector<4x16x1xf32> to vector<4x16x16xf32>
    %77 = arith.mulf %72, %76 : vector<4x16x16xf32>
    %cst_24 = arith.constant dense<0.000000e+00> : vector<4x16x8xf32>
    %78 = tpu.matmul %77, %64, %cst_24 {dimension_numbers = #tpu.dot_dimension_numbers<[2], [1], [1], [2], [0, 0, 0, 1, 1, 2], [0], [0]>} : vector<4x16x16xf32>, vector<4x16x8xf32>, vector<4x16x8xf32> -> vector<4x16x8xf32>
    %c0_25 = arith.constant 0 : index
    %c0_26 = arith.constant 0 : index
    %c0_27 = arith.constant 0 : index
    %c0_28 = arith.constant 0 : index
    %79 = vector.load %arg5[%c0_25, %c0_26, %c0_27, %c0_28] : memref<2x4x8x32xf32, #tpu.memory_space<vmem>>, vector<1x4x8x32xf32>
    %80 = vector.shape_cast %79 : vector<1x4x8x32xf32> to vector<4x8x32xf32>
    %cst_29 = arith.constant dense<0.000000e+00> : vector<4x16x32xf32>
    %81 = tpu.matmul %78, %80, %cst_29 {dimension_numbers = #tpu.dot_dimension_numbers<[2], [1], [1], [2], [0, 0, 0, 1, 1, 2], [0], [0]>} : vector<4x16x8xf32>, vector<4x8x32xf32>, vector<4x16x32xf32> -> vector<4x16x32xf32>
    %cst_30 = arith.constant dense<0.000000e+00> : vector<16x32xf32>
    %82 = vector.multi_reduction <add>, %81, %cst_30 [0] : vector<4x16x32xf32> to vector<16x32xf32>
    %83 = vector.extract_strided_slice %30 {offsets = [0, 0], sizes = [1, 32], strides = [1, 1]} : vector<6x32xf32> to vector<1x32xf32>
    %84 = vector.broadcast %83 : vector<1x32xf32> to vector<16x32xf32>
    %85 = arith.addf %82, %84 : vector<16x32xf32>
    %86 = arith.addf %27, %85 : vector<16x32xf32>
    %87 = vector.extract_strided_slice %30 {offsets = [1, 0], sizes = [1, 32], strides = [1, 1]} : vector<6x32xf32> to vector<1x32xf32>
    %88 = vector.extract_strided_slice %30 {offsets = [2, 0], sizes = [1, 32], strides = [1, 1]} : vector<6x32xf32> to vector<1x32xf32>
    %cst_31 = arith.constant dense<0.000000e+00> : vector<16xf32>
    %89 = vector.multi_reduction <add>, %86, %cst_31 [1] : vector<16x32xf32> to vector<16xf32>
    %90 = vector.shape_cast %89 : vector<16xf32> to vector<16x1xf32>
    %cst_32 = arith.constant 3.200000e+01 : f32
    %91 = vector.broadcast %cst_32 : f32 to vector<16x1xf32>
    %92 = arith.divf %90, %91 : vector<16x1xf32>
    %93 = arith.mulf %86, %86 : vector<16x32xf32>
    %cst_33 = arith.constant dense<0.000000e+00> : vector<16xf32>
    %94 = vector.multi_reduction <add>, %93, %cst_33 [1] : vector<16x32xf32> to vector<16xf32>
    %95 = vector.shape_cast %94 : vector<16xf32> to vector<16x1xf32>
    %cst_34 = arith.constant 3.200000e+01 : f32
    %96 = vector.broadcast %cst_34 : f32 to vector<16x1xf32>
    %97 = arith.divf %95, %96 : vector<16x1xf32>
    %98 = arith.mulf %92, %92 : vector<16x1xf32>
    %99 = arith.subf %97, %98 : vector<16x1xf32>
    %cst_35 = arith.constant 0.000000e+00 : f32
    %100 = vector.broadcast %cst_35 : f32 to vector<16x1xf32>
    %101 = arith.maximumf %99, %100 : vector<16x1xf32>
    %102 = vector.broadcast %92 : vector<16x1xf32> to vector<16x32xf32>
    %103 = arith.subf %86, %102 : vector<16x32xf32>
    %cst_36 = arith.constant 9.99999996E-13 : f32
    %104 = vector.broadcast %cst_36 : f32 to vector<16x1xf32>
    %105 = arith.addf %101, %104 : vector<16x1xf32>
    %106 = math.rsqrt %105 : vector<16x1xf32>
    %107 = vector.broadcast %106 : vector<16x1xf32> to vector<16x32xf32>
    %108 = arith.mulf %103, %107 : vector<16x32xf32>
    %109 = vector.broadcast %87 : vector<1x32xf32> to vector<16x32xf32>
    %110 = arith.mulf %108, %109 : vector<16x32xf32>
    %111 = vector.broadcast %88 : vector<1x32xf32> to vector<16x32xf32>
    %112 = arith.addf %110, %111 : vector<16x32xf32>
    %c0_37 = arith.constant 0 : index
    %c0_38 = arith.constant 0 : index
    %c0_39 = arith.constant 0 : index
    %113 = vector.load %arg7[%c0_37, %c0_38, %c0_39] : memref<2x32x64xf32, #tpu.memory_space<vmem>>, vector<1x32x64xf32>
    %114 = vector.shape_cast %113 : vector<1x32x64xf32> to vector<32x64xf32>
    %cst_40 = arith.constant dense<0.000000e+00> : vector<16x64xf32>
    %115 = tpu.matmul %112, %114, %cst_40 {dimension_numbers = #tpu.dot_dimension_numbers<[1], [0], [0], [1], [0, 0, 1, 1], [], []>} : vector<16x32xf32>, vector<32x64xf32>, vector<16x64xf32> -> vector<16x64xf32>
    %c0_41 = arith.constant 0 : index
    %c0_42 = arith.constant 0 : index
    %c0_43 = arith.constant 0 : index
    %116 = vector.load %arg8[%c0_41, %c0_42, %c0_43] : memref<2x1x64xf32, #tpu.memory_space<vmem>>, vector<1x1x64xf32>
    %117 = vector.shape_cast %116 : vector<1x1x64xf32> to vector<1x64xf32>
    %118 = vector.broadcast %117 : vector<1x64xf32> to vector<16x64xf32>
    %119 = arith.addf %115, %118 : vector<16x64xf32>
    %cst_44 = arith.constant 5.000000e-01 : f32
    %120 = vector.broadcast %cst_44 : f32 to vector<16x64xf32>
    %121 = arith.mulf %120, %119 : vector<16x64xf32>
    %cst_45 = arith.constant 4.471500e-02 : f32
    %122 = vector.broadcast %cst_45 : f32 to vector<16x64xf32>
    %123 = arith.mulf %122, %119 : vector<16x64xf32>
    %124 = arith.mulf %123, %119 : vector<16x64xf32>
    %125 = arith.mulf %124, %119 : vector<16x64xf32>
    %126 = arith.addf %119, %125 : vector<16x64xf32>
    %cst_46 = arith.constant 0.797884583 : f32
    %127 = vector.broadcast %cst_46 : f32 to vector<16x64xf32>
    %128 = arith.mulf %127, %126 : vector<16x64xf32>
    %129 = math.tanh %128 : vector<16x64xf32>
    %cst_47 = arith.constant 1.000000e+00 : f32
    %130 = vector.broadcast %cst_47 : f32 to vector<16x64xf32>
    %131 = arith.addf %130, %129 : vector<16x64xf32>
    %132 = arith.mulf %121, %131 : vector<16x64xf32>
    %c0_48 = arith.constant 0 : index
    %c0_49 = arith.constant 0 : index
    %c0_50 = arith.constant 0 : index
    %133 = vector.load %arg9[%c0_48, %c0_49, %c0_50] : memref<2x64x32xf32, #tpu.memory_space<vmem>>, vector<1x64x32xf32>
    %134 = vector.shape_cast %133 : vector<1x64x32xf32> to vector<64x32xf32>
    %cst_51 = arith.constant dense<0.000000e+00> : vector<16x32xf32>
    %135 = tpu.matmul %132, %134, %cst_51 {dimension_numbers = #tpu.dot_dimension_numbers<[1], [0], [0], [1], [0, 0, 1, 1], [], []>} : vector<16x64xf32>, vector<64x32xf32>, vector<16x32xf32> -> vector<16x32xf32>
    %136 = vector.extract_strided_slice %30 {offsets = [3, 0], sizes = [1, 32], strides = [1, 1]} : vector<6x32xf32> to vector<1x32xf32>
    %137 = vector.broadcast %136 : vector<1x32xf32> to vector<16x32xf32>
    %138 = arith.addf %135, %137 : vector<16x32xf32>
    %139 = arith.addf %112, %138 : vector<16x32xf32>
    %140 = vector.extract_strided_slice %30 {offsets = [4, 0], sizes = [1, 32], strides = [1, 1]} : vector<6x32xf32> to vector<1x32xf32>
    %141 = vector.extract_strided_slice %30 {offsets = [5, 0], sizes = [1, 32], strides = [1, 1]} : vector<6x32xf32> to vector<1x32xf32>
    %cst_52 = arith.constant dense<0.000000e+00> : vector<16xf32>
    %142 = vector.multi_reduction <add>, %139, %cst_52 [1] : vector<16x32xf32> to vector<16xf32>
    %143 = vector.shape_cast %142 : vector<16xf32> to vector<16x1xf32>
    %cst_53 = arith.constant 3.200000e+01 : f32
    %144 = vector.broadcast %cst_53 : f32 to vector<16x1xf32>
    %145 = arith.divf %143, %144 : vector<16x1xf32>
    %146 = arith.mulf %139, %139 : vector<16x32xf32>
    %cst_54 = arith.constant dense<0.000000e+00> : vector<16xf32>
    %147 = vector.multi_reduction <add>, %146, %cst_54 [1] : vector<16x32xf32> to vector<16xf32>
    %148 = vector.shape_cast %147 : vector<16xf32> to vector<16x1xf32>
    %cst_55 = arith.constant 3.200000e+01 : f32
    %149 = vector.broadcast %cst_55 : f32 to vector<16x1xf32>
    %150 = arith.divf %148, %149 : vector<16x1xf32>
    %151 = arith.mulf %145, %145 : vector<16x1xf32>
    %152 = arith.subf %150, %151 : vector<16x1xf32>
    %cst_56 = arith.constant 0.000000e+00 : f32
    %153 = vector.broadcast %cst_56 : f32 to vector<16x1xf32>
    %154 = arith.maximumf %152, %153 : vector<16x1xf32>
    %155 = vector.broadcast %145 : vector<16x1xf32> to vector<16x32xf32>
    %156 = arith.subf %139, %155 : vector<16x32xf32>
    %cst_57 = arith.constant 9.99999996E-13 : f32
    %157 = vector.broadcast %cst_57 : f32 to vector<16x1xf32>
    %158 = arith.addf %154, %157 : vector<16x1xf32>
    %159 = math.rsqrt %158 : vector<16x1xf32>
    %160 = vector.broadcast %159 : vector<16x1xf32> to vector<16x32xf32>
    %161 = arith.mulf %156, %160 : vector<16x32xf32>
    %162 = vector.broadcast %140 : vector<1x32xf32> to vector<16x32xf32>
    %163 = arith.mulf %161, %162 : vector<16x32xf32>
    %164 = vector.broadcast %141 : vector<1x32xf32> to vector<16x32xf32>
    %165 = arith.addf %163, %164 : vector<16x32xf32>
    %c1 = arith.constant 1 : index
    %c0_58 = arith.constant 0 : index
    %c0_59 = arith.constant 0 : index
    %166 = vector.load %arg6[%c1, %c0_58, %c0_59] : memref<2x6x32xf32, #tpu.memory_space<vmem>>, vector<1x6x32xf32>
    %167 = vector.shape_cast %166 : vector<1x6x32xf32> to vector<6x32xf32>
    %c1_60 = arith.constant 1 : index
    %c0_61 = arith.constant 0 : index
    %c0_62 = arith.constant 0 : index
    %168 = vector.load %arg3[%c1_60, %c0_61, %c0_62] : memref<2x32x96xf32, #tpu.memory_space<vmem>>, vector<1x32x96xf32>
    %169 = vector.shape_cast %168 : vector<1x32x96xf32> to vector<32x96xf32>
    %cst_63 = arith.constant dense<0.000000e+00> : vector<16x96xf32>
    %170 = tpu.matmul %165, %169, %cst_63 {dimension_numbers = #tpu.dot_dimension_numbers<[1], [0], [0], [1], [0, 0, 1, 1], [], []>} : vector<16x32xf32>, vector<32x96xf32>, vector<16x96xf32> -> vector<16x96xf32>
    %c1_64 = arith.constant 1 : index
    %c0_65 = arith.constant 0 : index
    %c0_66 = arith.constant 0 : index
    %171 = vector.load %arg4[%c1_64, %c0_65, %c0_66] : memref<2x1x96xf32, #tpu.memory_space<vmem>>, vector<1x1x96xf32>
    %172 = vector.shape_cast %171 : vector<1x1x96xf32> to vector<1x96xf32>
    %173 = vector.broadcast %172 : vector<1x96xf32> to vector<16x96xf32>
    %174 = arith.addf %170, %173 : vector<16x96xf32>
    %175 = vector.extract_strided_slice %174 {offsets = [0, 0], sizes = [16, 8], strides = [1, 1]} : vector<16x96xf32> to vector<16x8xf32>
    %176 = vector.extract_strided_slice %174 {offsets = [0, 8], sizes = [16, 8], strides = [1, 1]} : vector<16x96xf32> to vector<16x8xf32>
    %177 = vector.extract_strided_slice %174 {offsets = [0, 16], sizes = [16, 8], strides = [1, 1]} : vector<16x96xf32> to vector<16x8xf32>
    %178 = vector.extract_strided_slice %174 {offsets = [0, 24], sizes = [16, 8], strides = [1, 1]} : vector<16x96xf32> to vector<16x8xf32>
    %179 = vector.shape_cast %175 : vector<16x8xf32> to vector<1x16x8xf32>
    %180 = vector.shape_cast %176 : vector<16x8xf32> to vector<1x16x8xf32>
    %181 = vector.shape_cast %177 : vector<16x8xf32> to vector<1x16x8xf32>
    %182 = vector.shape_cast %178 : vector<16x8xf32> to vector<1x16x8xf32>
    %183 = tpu.concatenate %179, %180, %181, %182 in 0 : vector<1x16x8xf32>, vector<1x16x8xf32>, vector<1x16x8xf32>, vector<1x16x8xf32> -> vector<4x16x8xf32>
    %184 = vector.extract_strided_slice %174 {offsets = [0, 32], sizes = [16, 8], strides = [1, 1]} : vector<16x96xf32> to vector<16x8xf32>
    %185 = vector.extract_strided_slice %174 {offsets = [0, 40], sizes = [16, 8], strides = [1, 1]} : vector<16x96xf32> to vector<16x8xf32>
    %186 = vector.extract_strided_slice %174 {offsets = [0, 48], sizes = [16, 8], strides = [1, 1]} : vector<16x96xf32> to vector<16x8xf32>
    %187 = vector.extract_strided_slice %174 {offsets = [0, 56], sizes = [16, 8], strides = [1, 1]} : vector<16x96xf32> to vector<16x8xf32>
    %188 = vector.shape_cast %184 : vector<16x8xf32> to vector<1x16x8xf32>
    %189 = vector.shape_cast %185 : vector<16x8xf32> to vector<1x16x8xf32>
    %190 = vector.shape_cast %186 : vector<16x8xf32> to vector<1x16x8xf32>
    %191 = vector.shape_cast %187 : vector<16x8xf32> to vector<1x16x8xf32>
    %192 = tpu.concatenate %188, %189, %190, %191 in 0 : vector<1x16x8xf32>, vector<1x16x8xf32>, vector<1x16x8xf32>, vector<1x16x8xf32> -> vector<4x16x8xf32>
    %193 = vector.extract_strided_slice %174 {offsets = [0, 64], sizes = [16, 8], strides = [1, 1]} : vector<16x96xf32> to vector<16x8xf32>
    %194 = vector.extract_strided_slice %174 {offsets = [0, 72], sizes = [16, 8], strides = [1, 1]} : vector<16x96xf32> to vector<16x8xf32>
    %195 = vector.extract_strided_slice %174 {offsets = [0, 80], sizes = [16, 8], strides = [1, 1]} : vector<16x96xf32> to vector<16x8xf32>
    %196 = vector.extract_strided_slice %174 {offsets = [0, 88], sizes = [16, 8], strides = [1, 1]} : vector<16x96xf32> to vector<16x8xf32>
    %197 = vector.shape_cast %193 : vector<16x8xf32> to vector<1x16x8xf32>
    %198 = vector.shape_cast %194 : vector<16x8xf32> to vector<1x16x8xf32>
    %199 = vector.shape_cast %195 : vector<16x8xf32> to vector<1x16x8xf32>
    %200 = vector.shape_cast %196 : vector<16x8xf32> to vector<1x16x8xf32>
    %201 = tpu.concatenate %197, %198, %199, %200 in 0 : vector<1x16x8xf32>, vector<1x16x8xf32>, vector<1x16x8xf32>, vector<1x16x8xf32> -> vector<4x16x8xf32>
    %cst_67 = arith.constant dense<0.000000e+00> : vector<4x16x16xf32>
    %202 = tpu.matmul %183, %192, %cst_67 {dimension_numbers = #tpu.dot_dimension_numbers<[2], [2], [1], [1], [0, 0, 0, 1, 1, 1], [0], [0]>} : vector<4x16x8xf32>, vector<4x16x8xf32>, vector<4x16x16xf32> -> vector<4x16x16xf32>
    %203 = vector.broadcast %28 : vector<1x16x16xf32> to vector<4x16x16xf32>
    %204 = arith.addf %202, %203 : vector<4x16x16xf32>
    %cst_68 = arith.constant dense<0xFF800000> : vector<4x16xf32>
    %205 = vector.multi_reduction <maximumf>, %204, %cst_68 [2] : vector<4x16x16xf32> to vector<4x16xf32>
    %206 = vector.shape_cast %205 : vector<4x16xf32> to vector<4x16x1xf32>
    %207 = vector.broadcast %206 : vector<4x16x1xf32> to vector<4x16x16xf32>
    %208 = arith.subf %204, %207 : vector<4x16x16xf32>
    %209 = math.exp %208 : vector<4x16x16xf32>
    %cst_69 = arith.constant dense<0.000000e+00> : vector<4x16xf32>
    %210 = vector.multi_reduction <add>, %209, %cst_69 [2] : vector<4x16x16xf32> to vector<4x16xf32>
    %211 = vector.shape_cast %210 : vector<4x16xf32> to vector<4x16x1xf32>
    %212 = tpu.reciprocal %211 {approx = true} : vector<4x16x1xf32> -> vector<4x16x1xf32>
    %213 = vector.broadcast %212 : vector<4x16x1xf32> to vector<4x16x16xf32>
    %214 = arith.mulf %209, %213 : vector<4x16x16xf32>
    %cst_70 = arith.constant dense<0.000000e+00> : vector<4x16x8xf32>
    %215 = tpu.matmul %214, %201, %cst_70 {dimension_numbers = #tpu.dot_dimension_numbers<[2], [1], [1], [2], [0, 0, 0, 1, 1, 2], [0], [0]>} : vector<4x16x16xf32>, vector<4x16x8xf32>, vector<4x16x8xf32> -> vector<4x16x8xf32>
    %c1_71 = arith.constant 1 : index
    %c0_72 = arith.constant 0 : index
    %c0_73 = arith.constant 0 : index
    %c0_74 = arith.constant 0 : index
    %216 = vector.load %arg5[%c1_71, %c0_72, %c0_73, %c0_74] : memref<2x4x8x32xf32, #tpu.memory_space<vmem>>, vector<1x4x8x32xf32>
    %217 = vector.shape_cast %216 : vector<1x4x8x32xf32> to vector<4x8x32xf32>
    %cst_75 = arith.constant dense<0.000000e+00> : vector<4x16x32xf32>
    %218 = tpu.matmul %215, %217, %cst_75 {dimension_numbers = #tpu.dot_dimension_numbers<[2], [1], [1], [2], [0, 0, 0, 1, 1, 2], [0], [0]>} : vector<4x16x8xf32>, vector<4x8x32xf32>, vector<4x16x32xf32> -> vector<4x16x32xf32>
    %cst_76 = arith.constant dense<0.000000e+00> : vector<16x32xf32>
    %219 = vector.multi_reduction <add>, %218, %cst_76 [0] : vector<4x16x32xf32> to vector<16x32xf32>
    %220 = vector.extract_strided_slice %167 {offsets = [0, 0], sizes = [1, 32], strides = [1, 1]} : vector<6x32xf32> to vector<1x32xf32>
    %221 = vector.broadcast %220 : vector<1x32xf32> to vector<16x32xf32>
    %222 = arith.addf %219, %221 : vector<16x32xf32>
    %223 = arith.addf %165, %222 : vector<16x32xf32>
    %224 = vector.extract_strided_slice %167 {offsets = [1, 0], sizes = [1, 32], strides = [1, 1]} : vector<6x32xf32> to vector<1x32xf32>
    %225 = vector.extract_strided_slice %167 {offsets = [2, 0], sizes = [1, 32], strides = [1, 1]} : vector<6x32xf32> to vector<1x32xf32>
    %cst_77 = arith.constant dense<0.000000e+00> : vector<16xf32>
    %226 = vector.multi_reduction <add>, %223, %cst_77 [1] : vector<16x32xf32> to vector<16xf32>
    %227 = vector.shape_cast %226 : vector<16xf32> to vector<16x1xf32>
    %cst_78 = arith.constant 3.200000e+01 : f32
    %228 = vector.broadcast %cst_78 : f32 to vector<16x1xf32>
    %229 = arith.divf %227, %228 : vector<16x1xf32>
    %230 = arith.mulf %223, %223 : vector<16x32xf32>
    %cst_79 = arith.constant dense<0.000000e+00> : vector<16xf32>
    %231 = vector.multi_reduction <add>, %230, %cst_79 [1] : vector<16x32xf32> to vector<16xf32>
    %232 = vector.shape_cast %231 : vector<16xf32> to vector<16x1xf32>
    %cst_80 = arith.constant 3.200000e+01 : f32
    %233 = vector.broadcast %cst_80 : f32 to vector<16x1xf32>
    %234 = arith.divf %232, %233 : vector<16x1xf32>
    %235 = arith.mulf %229, %229 : vector<16x1xf32>
    %236 = arith.subf %234, %235 : vector<16x1xf32>
    %cst_81 = arith.constant 0.000000e+00 : f32
    %237 = vector.broadcast %cst_81 : f32 to vector<16x1xf32>
    %238 = arith.maximumf %236, %237 : vector<16x1xf32>
    %239 = vector.broadcast %229 : vector<16x1xf32> to vector<16x32xf32>
    %240 = arith.subf %223, %239 : vector<16x32xf32>
    %cst_82 = arith.constant 9.99999996E-13 : f32
    %241 = vector.broadcast %cst_82 : f32 to vector<16x1xf32>
    %242 = arith.addf %238, %241 : vector<16x1xf32>
    %243 = math.rsqrt %242 : vector<16x1xf32>
    %244 = vector.broadcast %243 : vector<16x1xf32> to vector<16x32xf32>
    %245 = arith.mulf %240, %244 : vector<16x32xf32>
    %246 = vector.broadcast %224 : vector<1x32xf32> to vector<16x32xf32>
    %247 = arith.mulf %245, %246 : vector<16x32xf32>
    %248 = vector.broadcast %225 : vector<1x32xf32> to vector<16x32xf32>
    %249 = arith.addf %247, %248 : vector<16x32xf32>
    %c1_83 = arith.constant 1 : index
    %c0_84 = arith.constant 0 : index
    %c0_85 = arith.constant 0 : index
    %250 = vector.load %arg7[%c1_83, %c0_84, %c0_85] : memref<2x32x64xf32, #tpu.memory_space<vmem>>, vector<1x32x64xf32>
    %251 = vector.shape_cast %250 : vector<1x32x64xf32> to vector<32x64xf32>
    %cst_86 = arith.constant dense<0.000000e+00> : vector<16x64xf32>
    %252 = tpu.matmul %249, %251, %cst_86 {dimension_numbers = #tpu.dot_dimension_numbers<[1], [0], [0], [1], [0, 0, 1, 1], [], []>} : vector<16x32xf32>, vector<32x64xf32>, vector<16x64xf32> -> vector<16x64xf32>
    %c1_87 = arith.constant 1 : index
    %c0_88 = arith.constant 0 : index
    %c0_89 = arith.constant 0 : index
    %253 = vector.load %arg8[%c1_87, %c0_88, %c0_89] : memref<2x1x64xf32, #tpu.memory_space<vmem>>, vector<1x1x64xf32>
    %254 = vector.shape_cast %253 : vector<1x1x64xf32> to vector<1x64xf32>
    %255 = vector.broadcast %254 : vector<1x64xf32> to vector<16x64xf32>
    %256 = arith.addf %252, %255 : vector<16x64xf32>
    %cst_90 = arith.constant 5.000000e-01 : f32
    %257 = vector.broadcast %cst_90 : f32 to vector<16x64xf32>
    %258 = arith.mulf %257, %256 : vector<16x64xf32>
    %cst_91 = arith.constant 4.471500e-02 : f32
    %259 = vector.broadcast %cst_91 : f32 to vector<16x64xf32>
    %260 = arith.mulf %259, %256 : vector<16x64xf32>
    %261 = arith.mulf %260, %256 : vector<16x64xf32>
    %262 = arith.mulf %261, %256 : vector<16x64xf32>
    %263 = arith.addf %256, %262 : vector<16x64xf32>
    %cst_92 = arith.constant 0.797884583 : f32
    %264 = vector.broadcast %cst_92 : f32 to vector<16x64xf32>
    %265 = arith.mulf %264, %263 : vector<16x64xf32>
    %266 = math.tanh %265 : vector<16x64xf32>
    %cst_93 = arith.constant 1.000000e+00 : f32
    %267 = vector.broadcast %cst_93 : f32 to vector<16x64xf32>
    %268 = arith.addf %267, %266 : vector<16x64xf32>
    %269 = arith.mulf %258, %268 : vector<16x64xf32>
    %c1_94 = arith.constant 1 : index
    %c0_95 = arith.constant 0 : index
    %c0_96 = arith.constant 0 : index
    %270 = vector.load %arg9[%c1_94, %c0_95, %c0_96] : memref<2x64x32xf32, #tpu.memory_space<vmem>>, vector<1x64x32xf32>
    %271 = vector.shape_cast %270 : vector<1x64x32xf32> to vector<64x32xf32>
    %cst_97 = arith.constant dense<0.000000e+00> : vector<16x32xf32>
    %272 = tpu.matmul %269, %271, %cst_97 {dimension_numbers = #tpu.dot_dimension_numbers<[1], [0], [0], [1], [0, 0, 1, 1], [], []>} : vector<16x64xf32>, vector<64x32xf32>, vector<16x32xf32> -> vector<16x32xf32>
    %273 = vector.extract_strided_slice %167 {offsets = [3, 0], sizes = [1, 32], strides = [1, 1]} : vector<6x32xf32> to vector<1x32xf32>
    %274 = vector.broadcast %273 : vector<1x32xf32> to vector<16x32xf32>
    %275 = arith.addf %272, %274 : vector<16x32xf32>
    %276 = arith.addf %249, %275 : vector<16x32xf32>
    %277 = vector.extract_strided_slice %167 {offsets = [4, 0], sizes = [1, 32], strides = [1, 1]} : vector<6x32xf32> to vector<1x32xf32>
    %278 = vector.extract_strided_slice %167 {offsets = [5, 0], sizes = [1, 32], strides = [1, 1]} : vector<6x32xf32> to vector<1x32xf32>
    %cst_98 = arith.constant dense<0.000000e+00> : vector<16xf32>
    %279 = vector.multi_reduction <add>, %276, %cst_98 [1] : vector<16x32xf32> to vector<16xf32>
    %280 = vector.shape_cast %279 : vector<16xf32> to vector<16x1xf32>
    %cst_99 = arith.constant 3.200000e+01 : f32
    %281 = vector.broadcast %cst_99 : f32 to vector<16x1xf32>
    %282 = arith.divf %280, %281 : vector<16x1xf32>
    %283 = arith.mulf %276, %276 : vector<16x32xf32>
    %cst_100 = arith.constant dense<0.000000e+00> : vector<16xf32>
    %284 = vector.multi_reduction <add>, %283, %cst_100 [1] : vector<16x32xf32> to vector<16xf32>
    %285 = vector.shape_cast %284 : vector<16xf32> to vector<16x1xf32>
    %cst_101 = arith.constant 3.200000e+01 : f32
    %286 = vector.broadcast %cst_101 : f32 to vector<16x1xf32>
    %287 = arith.divf %285, %286 : vector<16x1xf32>
    %288 = arith.mulf %282, %282 : vector<16x1xf32>
    %289 = arith.subf %287, %288 : vector<16x1xf32>
    %cst_102 = arith.constant 0.000000e+00 : f32
    %290 = vector.broadcast %cst_102 : f32 to vector<16x1xf32>
    %291 = arith.maximumf %289, %290 : vector<16x1xf32>
    %292 = vector.broadcast %282 : vector<16x1xf32> to vector<16x32xf32>
    %293 = arith.subf %276, %292 : vector<16x32xf32>
    %cst_103 = arith.constant 9.99999996E-13 : f32
    %294 = vector.broadcast %cst_103 : f32 to vector<16x1xf32>
    %295 = arith.addf %291, %294 : vector<16x1xf32>
    %296 = math.rsqrt %295 : vector<16x1xf32>
    %297 = vector.broadcast %296 : vector<16x1xf32> to vector<16x32xf32>
    %298 = arith.mulf %293, %297 : vector<16x32xf32>
    %299 = vector.broadcast %277 : vector<1x32xf32> to vector<16x32xf32>
    %300 = arith.mulf %298, %299 : vector<16x32xf32>
    %301 = vector.broadcast %278 : vector<1x32xf32> to vector<16x32xf32>
    %302 = arith.addf %300, %301 : vector<16x32xf32>
    %c0_104 = arith.constant 0 : index
    %c0_105 = arith.constant 0 : index
    %303 = vector.load %arg10[%c0_104, %c0_105] : memref<32x128xf32, #tpu.memory_space<vmem>>, vector<32x128xf32>
    %cst_106 = arith.constant dense<0.000000e+00> : vector<16x128xf32>
    %304 = tpu.matmul %302, %303, %cst_106 {dimension_numbers = #tpu.dot_dimension_numbers<[1], [0], [0], [1], [0, 0, 1, 1], [], []>} : vector<16x32xf32>, vector<32x128xf32>, vector<16x128xf32> -> vector<16x128xf32>
    %c0_107 = arith.constant 0 : index
    %c0_108 = arith.constant 0 : index
    %305 = vector.load %arg11[%c0_107, %c0_108] : memref<1x128xf32, #tpu.memory_space<vmem>>, vector<1x128xf32>
    %306 = vector.broadcast %305 : vector<1x128xf32> to vector<16x128xf32>
    %307 = arith.addf %304, %306 : vector<16x128xf32>
    %c0_109 = arith.constant 0 : index
    %c0_110 = arith.constant 0 : index
    %308 = vector.load %arg12[%c0_109, %c0_110] : memref<16x128xf32, #tpu.memory_space<vmem>>, vector<16x128xf32>
    tpu.vector_store %arg12[%c0_109, %c0_110], %307 {strides = array<i32>} : memref<16x128xf32, #tpu.memory_space<vmem>>, vector<16x128xf32>,
    return
  }
}

</mosaic_0001>

<bundles_post_ra>
// kernel: tpu_custom_call.1
= control target key start
LH: loop header
LB: loop body
LE: loop exit
PB: predicated region body
PF: predicated region fallthrough
CT: control target
= control target key end

     0   :  { %17 = vsyncpa [#allocation3], 0  ;;  %s4668_s0 = inlined_call_operand.hbm [shape: f32[1,16,16], index: 0, kind: input, shape index: {}]   ;;  %s4669_s1 = inlined_call_operand.hbm [shape: f32[16,32], index: 1, kind: input, shape index: {}]   ;;  %s4670_s2 = inlined_call_operand.vmem [shape: f32[2,32], index: 2, kind: input, shape index: {}]   ;;  %s4671_s3 = inlined_call_operand.vmem [shape: f32[2,32,96], index: 3, kind: input, shape index: {}]   ;;  %s4672_s4 = inlined_call_operand.hbm [shape: f32[2,1,96], index: 4, kind: input, shape index: {}]   ;;  %s4673_s5 = inlined_call_operand.vmem [shape: f32[2,4,8,32], index: 5, kind: input, shape index: {}]   ;;  %s4674_s6 = inlined_call_operand.vmem [shape: f32[2,6,32], index: 6, kind: input, shape index: {}]   ;;  %s4675_s7 = inlined_call_operand.vmem [shape: f32[2,32,64], index: 7, kind: input, shape index: {}]   ;;  %s4676_s8 = inlined_call_operand.vmem [shape: f32[2,1,64], index: 8, kind: input, shape index: {}]   ;;  %s4677_s9 = inlined_call_operand.vmem [shape: f32[2,64,32], index: 9, kind: input, shape index: {}]   ;;  %s4678_s10 = inlined_call_operand.vmem [shape: f32[32,128], index: 10, kind: input, shape index: {}]   ;;  %s4679_s11 = inlined_call_operand.vmem [shape: f32[1,128], index: 11, kind: input, shape index: {}]   ;;  %s4680_s12 = inlined_call_operand.hbm [shape: f32[16,128], index: 12, kind: output, shape index: {}]  }
   0x1   :  { %18 = vsyncpa [#allocation6], 0 }
   0x2   :  { %19 = vsyncpa [#allocation4], 0  ;;  %s4003_s21 = smov [#allocation5]   ;;  %s4004_s23 = smov [#allocation2]  }
   0x3   :  { %s37_s22 = sshll.u32 %s4003_s21, 4  ;;  %s25_s24 = sshll.u32 %s4004_s23, 4  ;;  %s38_s22 = int_to_ptr.vmem [resolvable:$true] %s37_s22  ;;  %s26_s24 = int_to_ptr.vmem [resolvable:$true] %s25_s24 }
   0x4   :  { %s3925_s25 = scalar_lea.vmem %s38_s22, 256  ;;  %p3930_p1 = scmp.lt.s32.totalorder %s38_s22, %s38_s22 }
   0x5   :  { %p3926_p0 = scmp.ne.s32.totalorder %s38_s22, %s3925_s25  ;;  %p3931_p2 = scmp.lt.s32.totalorder %s3925_s25, %s3925_s25 }
   0x7   :  { %p3932_p3 = por %p3931_p2, %p3930_p1 }
   0x9   :  { %p3933_p4 = pnand %p3932_p3, %p3926_p0 }
   0xb   :  { %3936 = shalt.err (!%p3933_p4)
}
   0xc   :  { %s4005_s26 = smov 128   ;;  %s4006_s27 = smov 8  }
   0xd   :  { %43 = dma.hbm_to_vmem [thread:$0]  %s4669_s1, 256, %s38_s22, [#allocation6], %s4005_s26, %s4005_s26, %s4006_s27  }
   0xe   :  { %s3945_s30 = scalar_lea.vmem %s26_s24, 256  ;;  %p3950_p6 = scmp.lt.s32.totalorder %s26_s24, %s26_s24 }
   0xf   :  { %p3946_p5 = scmp.ne.s32.totalorder %s26_s24, %s3945_s30  ;;  %p3951_p7 = scmp.lt.s32.totalorder %s3945_s30, %s3945_s30 }
  0x11   :  { %p3952_p8 = por %p3951_p7, %p3950_p6 }
  0x13   :  { %p3953_p9 = pnand %p3952_p8, %p3946_p5 }
  0x15   :  { %3956 = shalt.err (!%p3953_p9)
}
  0x16   :  { %31 = dma.hbm_to_vmem [thread:$0]  %s4668_s0, 256, %s26_s24, [#allocation3], %s4005_s26, %s4005_s26, %s4006_s27  }
  0x17   :  { %s4007_s15 = smov [#allocation7]  }
  0x18   :  { %s53_s16 = sshll.u32 %s4007_s15, 4  ;;  %s54_s16 = int_to_ptr.vmem [resolvable:$true] %s53_s16 }
  0x19   :  { %s3965_s17 = scalar_lea.vmem %s54_s16, 32  ;;  %p3970_p11 = scmp.lt.s32.totalorder %s54_s16, %s54_s16 }
  0x1a   :  { %p3966_p10 = scmp.ne.s32.totalorder %s54_s16, %s3965_s17  ;;  %p3971_p12 = scmp.lt.s32.totalorder %s3965_s17, %s3965_s17 }
  0x1c   :  { %p3972_p13 = por %p3971_p12, %p3970_p11 }
  0x1e   :  { %p3973_p0 = pnand %p3972_p13, %p3966_p10 }
  0x20   :  { %3976 = shalt.err (!%p3973_p0)
}
  0x21   :  { %s4008_s1 = smov 16   ;;  %s4009_s18 = smov 1  }
  0x22   :  { %59 = dma.hbm_to_vmem [thread:$0]  %s4672_s4, 32, %s54_s16, [#allocation6], %s4008_s1, %s4008_s1, %s4009_s18  }
  0x23   :  { %3997 = dma.done.wait [#allocation3], 256  }
  0x24   :  { %3998 = vsyncadd [#allocation3], 4294967040 }
  0x25   :  { %3999 = dma.done.wait [#allocation6], 288  }
  0x26   :  { %4000 = vsyncadd [#allocation6], 4294967008  ;;  %vm86_vm0 = vcmask 261120   ;;  %v84_v0 = vld [vmem:[#allocation5] sm:$0xff]  ;;  %v85_v1 = vld [vmem:[#allocation5 + $0x8] sm:$0xff]  ;;  %v120_v27 = vlaneseq  ;;  %vm245_vm1 = vcmask 64512  }
  0x27   :  { %v87_v2 = vsel %vm86_vm0, %v84_v0, 0.0  ;;  %v96_v3 = vmul.f32 %v84_v0, %v84_v0  ;;  %v97_v4 = vmul.f32 %v85_v1, %v85_v1  ;;  %v90_v6 = vsel %vm86_vm0, %v85_v1, 0.0  ;;  %v138_v8 = vld [vmem:[%s4671_s3 + $0x18] sm:$0xff]  ;;  %v137_v9 = vld [vmem:[%s4671_s3 + $0x10] sm:$0xff]  ;;  %v136_v10 = vld [vmem:[%s4671_s3 + $0x8] sm:$0xff]  ;;  %s4011_s13 = smov 120  }
  0x28   :  { %88 = vadd.xlane.f32.xlu0 %v87_v2  ;;  %3567 = vmatprep.subr.mxu0 %v138_v8  ;;  %v135_v11 = vld [vmem:[%s4671_s3] sm:$0xff]  ;;  %v4112_v29 = vshrl.u32 %v120_v27, 7  ;;  %s4012_s14 = smov 96   ;;  %s4013_s15 = smov 104   ;;  %vm590_vm2 = vcmask 130048   ;;  %vm1543_vm3 = vcmask 523264  }
  0x29   :  { %v98_v5 = vsel %vm86_vm0, %v96_v3, 0.0  ;;  %v101_v7 = vsel %vm86_vm0, %v97_v4, 0.0  ;;  %3568 = vmatpush3.msra.mxu0 %v138_v8  ;;  %v83_v31 = vld [vmem:[%s4670_s2] sm:$0x3]  ;;  %s4010_s2 = smov 112   ;;  %s4014_s16 = smov 64  }
  0x2a   :  { %99 = vadd.xlane.f32.xlu1 %v98_v5  ;;  %3569 = vmatprep.subr.mxu0 %v137_v9  ;;  %v4115_v30 = vsub.s32 0, %v4112_v29  ;;  %v4121_v32 = vsub.s32 1, %v4112_v29  ;;  %v3324_v45 = vld [vmem:[#allocation7] ss:$0 sm:$0xff]  ;;  %s4015_s23 = smov [#allocation8]  }
  0x2b   :  { %3570 = vmatpush3.msra.mxu0 %v137_v9  ;;  %v4211_v2 = vld [vmem:[#allocation2] sm:$0xff]  ;;  %s3311_s24 = sshll.u32 %s4015_s23, 4  ;;  %s3312_s24 = int_to_ptr.vmem [resolvable:$true] %s3311_s24 }
  0x2c   :  { %91 = vadd.xlane.f32.xlu0 %v90_v6  ;;  %3571 = vmatprep.subr.mxu0 %v136_v10  ;;  %v123_v34 = vrot.slane %v83_v31, %v4115_v30  ;;  %v129_v37 = vrot.slane %v83_v31, %v4121_v32  ;;  %s3977_s25 = scalar_lea.vmem %s3312_s24, 256  ;;  %p3982_p2 = scmp.lt.s32.totalorder %s3312_s24, %s3312_s24 }
  0x2d   :  { %3572 = vmatpush3.msra.mxu0 %v136_v10  ;;  %p3978_p1 = scmp.ne.s32.totalorder %s3312_s24, %s3977_s25  ;;  %p3983_p3 = scmp.lt.s32.totalorder %s3977_s25, %s3977_s25 }
  0x2e   :  { %102 = vadd.xlane.f32.xlu1 %v101_v7  ;;  %3573 = vmatprep.subr.mxu0 %v135_v11 }
  0x2f   :  { %3574 = vmatpush3.msra.mxu0 %v135_v11  ;;  %p3984_p4 = por %p3983_p3, %p3982_p2 }
  0x31   :  { %p3985_p5 = pnand %p3984_p4, %p3978_p1 }
  0xb1   :  { %v89_v12 = vpop.xlane.xlu0 %88 }
  0xb2   :  { %v94_v13 = vmul.f32 0.03125, %v89_v12 }
  0xb3   :  { %v100_v14 = vpop.xlane.xlu1 %99 }
  0xb4   :  { %v106_v15 = vmul.f32 %v94_v13, %v94_v13  ;;  %v104_v16 = vmul.f32 0.03125, %v100_v14  ;;  %v112_v33 = vsub.f32 %v84_v0, %v94_v13  ;;  %v4209_v0 = vld [vmem:[#allocation2 + $0x8] sm:$0xff] }
  0xb5   :  { %v92_v17 = vpop.xlane.xlu0 %91 }
  0xb6   :  { %v108_v18 = vsub.f32 %v104_v16, %v106_v15  ;;  %v95_v19 = vmul.f32 0.03125, %v92_v17 }
  0xb7   :  { %v103_v20 = vpop.xlane.xlu1 %102 }
  0xb8   :  { %v110_v21 = vmax.f32 %v108_v18, 0.0  ;;  %v107_v22 = vmul.f32 %v95_v19, %v95_v19  ;;  %v105_v23 = vmul.f32 0.03125, %v103_v20  ;;  %v113_v38 = vsub.f32 %v85_v1, %v95_v19 }
  0xba   :  { %v114_v24 = vadd.f32 1e-12, %v110_v21  ;;  %v109_v25 = vsub.f32 %v105_v23, %v107_v22 }
  0xbc   :  { %3825 = vrsqrt.f32 %v114_v24  ;;  %v111_v26 = vmax.f32 %v109_v25, 0.0 }
  0xbe   :  { %v115_v28 = vadd.f32 1e-12, %v111_v26 }
  0xc0   :  { %3827 = vrsqrt.f32 %v115_v28 }
  0xc9   :  { %v3826_v35 = vpop.eup %3825 }
  0xca   :  { %v118_v36 = vmul.f32 %v3826_v35, %v112_v33 }
  0xcc   :  { %v124_v39 = vmul.f32 %v123_v34, %v118_v36 }
  0xcd   :  { %v3828_v40 = vpop.eup %3827 }
  0xce   :  { %v119_v41 = vmul.f32 %v3828_v40, %v113_v38  ;;  %v4125_v42 = vadd.f32 %v129_v37, %v124_v39 }
  0xd0   :  { %v125_v43 = vmul.f32 %v123_v34, %v119_v41  ;;  %3575 = vmatprep.mubr.msk.f32.mxu0 %vm86_vm0, %v4125_v42 }
  0xd2   :  { %v4129_v44 = vadd.f32 %v129_v37, %v125_v43 }
  0xd4   :  { %3576 = vmatmul.mubr.msk.f32.vlgmr.msra.gmra.mxu0 %vm86_vm0, %v4129_v44 }
 0x194   :  { %v3577_v46 = vpop.f32.mrf.mxu0 }
 0x195   :  { %v4133_v47 = vadd.f32 %v3577_v46, %v3324_v45 }
 0x196   :  { %v218_v48 = vpop.f32.mrf.mxu0 }
 0x197   :  { %v4135_v49 = vadd.f32 %v3324_v45, %v218_v48  ;;  %235 = vrot.lane.b32.xlu1 %v4133_v47, %s4010_s2  ;;  %231 = vrot.lane.b32.xlu0 %v4133_v47, %s4011_s13 }
 0x199   :  { %3582 = vmatprep.mubr.msk.f32.mxu1 %vm245_vm1, %v4135_v49 }
 0x19b   :  { %233 = vrot.lane.b32.xlu0 %v4135_v49, %s4010_s2  ;;  %229 = vrot.lane.b32.xlu1 %v4135_v49, %s4011_s13 }
 0x19f   :  { %243 = vrot.lane.b32.xlu0 %v4133_v47, %s4012_s14  ;;  %239 = vrot.lane.b32.xlu1 %v4133_v47, %s4013_s15 }
 0x1a3   :  { %241 = vrot.lane.b32.xlu0 %v4135_v49, %s4012_s14  ;;  %237 = vrot.lane.b32.xlu1 %v4135_v49, %s4013_s15 }
 0x209   :  { %v4155_v50 = vpop.permute.xlu1 %235  ;;  %v4157_v51 = vpop.permute.xlu0 %231 }
 0x20a   :  { %418 = vrot.lane.b32.xlu0 %v4155_v50, %s4012_s14  ;;  %331 = vrot.lane.b32.xlu1 %v4157_v51, %s4012_s14 }
 0x20d   :  { %v4163_v52 = vpop.permute.xlu0 %233  ;;  %v4165_v53 = vpop.permute.xlu1 %229 }
 0x20e   :  { %416 = vrot.lane.b32.xlu0 %v4163_v52, %s4012_s14  ;;  %3589 = vmatprep.mubr.msk.f32.mxu0 %vm245_vm1, %v4165_v53 }
 0x20f   :  { %329 = vrot.lane.b32.xlu1 %v4165_v53, %s4012_s14 }
 0x211   :  { %v244_v54 = vpop.permute.xlu0 %243  ;;  %v4173_v55 = vpop.permute.xlu1 %239 }
 0x212   :  { %3578 = vmatprep.subr.msk.mxu1 %vm245_vm1, %v244_v54 }
 0x213   :  { %505 = vrot.lane.b32.xlu1 %v4173_v55, %s4012_s14  ;;  %3579 = vmatpush3.xpose.msk.msra.mxu1 %vm245_vm1, %v244_v54 }
 0x215   :  { %v242_v56 = vpop.permute.xlu0 %241  ;;  %v4179_v57 = vpop.permute.xlu1 %237 }
 0x216   :  { %3580 = vmatprep.subr.msk.mxu1 %vm245_vm1, %v242_v56 }
 0x217   :  { %503 = vrot.lane.b32.xlu1 %v4179_v57, %s4012_s14  ;;  %3581 = vmatpush3.xpose.msk.msra.mxu1 %vm245_vm1, %v242_v56 }
 0x21a   :  { %3583 = vmatmul.mubr.msk.f32.vlgmr.msra.gmra.mxu1 %vm245_vm1, %v4133_v47 }
 0x21b   :  { %3596 = vmatprep.mubr.msk.f32.mxu1 %vm245_vm1, %v4163_v52 }
 0x27c   :  { %v419_v58 = vpop.permute.xlu0 %418  ;;  %v332_v59 = vpop.permute.xlu1 %331 }
 0x27d   :  { %3585 = vmatprep.subr.msk.mxu0 %vm245_vm1, %v332_v59  ;;  %3592 = vmatprep.subr.msk.mxu1 %vm245_vm1, %v419_v58 }
 0x27e   :  { %3586 = vmatpush3.xpose.msk.msra.mxu0 %vm245_vm1, %v332_v59  ;;  %3593 = vmatpush3.xpose.msk.msra.mxu1 %vm245_vm1, %v419_v58 }
 0x280   :  { %v417_v60 = vpop.permute.xlu0 %416 }
 0x281   :  { %v330_v61 = vpop.permute.xlu1 %329  ;;  %3594 = vmatprep.subr.msk.mxu1 %vm245_vm1, %v417_v60 }
 0x282   :  { %3587 = vmatprep.subr.msk.mxu0 %vm245_vm1, %v330_v61  ;;  %3595 = vmatpush3.xpose.msk.msra.mxu1 %vm245_vm1, %v417_v60 }
 0x283   :  { %3588 = vmatpush3.xpose.msk.msra.mxu0 %vm245_vm1, %v330_v61 }
 0x285   :  { %v506_v62 = vpop.permute.xlu1 %505  ;;  %3597 = vmatmul.mubr.msk.f32.vlgmr.msra.gmra.mxu1 %vm245_vm1, %v4155_v50 }
 0x286   :  { %3590 = vmatmul.mubr.msk.f32.vlgmr.msra.gmra.mxu0 %vm245_vm1, %v4157_v51  ;;  %3599 = vmatprep.subr.msk.mxu0 %vm245_vm1, %v506_v62 }
 0x287   :  { %3600 = vmatpush3.xpose.msk.msra.mxu0 %vm245_vm1, %v506_v62  ;;  %3603 = vmatprep.mubr.msk.f32.mxu0 %vm245_vm1, %v4179_v57 }
 0x289   :  { %v504_v63 = vpop.permute.xlu1 %503 }
 0x28a   :  { %3601 = vmatprep.subr.msk.mxu0 %vm245_vm1, %v504_v63 }
 0x28b   :  { %3602 = vmatpush3.xpose.msk.msra.mxu0 %vm245_vm1, %v504_v63 }
 0x28e   :  { %3604 = vmatmul.mubr.msk.f32.vlgmr.msra.gmra.mxu0 %vm245_vm1, %v4173_v55 }
 0x2da   :  { %v3584_v1 = vpop.f32.mrf.mxu1 }
 0x2db   :  { %v326_v3 = vadd.f32 %v3584_v1, %v4209_v0 }
 0x2dc   :  { %v320_v4 = vpop.f32.mrf.mxu1 }
 0x2dd   :  { %v321_v5 = vadd.f32 %v320_v4, %v4211_v2  ;;  %v594_v6 = vsel %vm590_vm2, %v326_v3, -inf }
 0x2de   :  { %595 = vmax.xlane.f32.xlu1 %v594_v6 }
 0x2df   :  { %v591_v7 = vsel %vm590_vm2, %v321_v5, -inf }
 0x2e0   :  { %592 = vmax.xlane.f32.xlu0 %v591_v7 }
 0x345   :  { %v3598_v8 = vpop.f32.mrf.mxu1 }
 0x346   :  { %v3591_v9 = vpop.f32.mrf.mxu0  ;;  %v500_v10 = vadd.f32 %v3598_v8, %v4209_v0 }
 0x347   :  { %v413_v11 = vadd.f32 %v3591_v9, %v4209_v0  ;;  %v494_v16 = vpop.f32.mrf.mxu1 }
 0x348   :  { %v407_v12 = vpop.f32.mrf.mxu0  ;;  %v606_v13 = vsel %vm590_vm2, %v500_v10, -inf  ;;  %v495_v17 = vadd.f32 %v494_v16, %v4211_v2 }
 0x349   :  { %v408_v14 = vadd.f32 %v407_v12, %v4211_v2  ;;  %607 = vmax.xlane.f32.xlu1 %v606_v13  ;;  %v600_v15 = vsel %vm590_vm2, %v413_v11, -inf }
 0x34a   :  { %601 = vmax.xlane.f32.xlu0 %v600_v15  ;;  %v603_v24 = vsel %vm590_vm2, %v495_v17, -inf }
 0x34b   :  { %v597_v18 = vsel %vm590_vm2, %v408_v14, -inf }
 0x34e   :  { %v3605_v19 = vpop.f32.mrf.mxu0  ;;  %598 = vmax.xlane.f32.xlu0 %v597_v18 }
 0x34f   :  { %v587_v20 = vadd.f32 %v3605_v19, %v4209_v0 }
 0x350   :  { %v581_v21 = vpop.f32.mrf.mxu0 }
 0x351   :  { %v582_v22 = vadd.f32 %v581_v21, %v4211_v2  ;;  %v612_v23 = vsel %vm590_vm2, %v587_v20, -inf }
 0x352   :  { %613 = vmax.xlane.f32.xlu1 %v612_v23  ;;  %604 = vmax.xlane.f32.xlu0 %v603_v24 }
 0x353   :  { %v609_v25 = vsel %vm590_vm2, %v582_v22, -inf }
 0x356   :  { %610 = vmax.xlane.f32.xlu0 %v609_v25 }
 0x363   :  { %679 = vrot.lane.b32.xlu1 %v4135_v49, %s4014_s16 }
 0x367   :  { %768 = vrot.lane.b32.xlu1 %v4157_v51, %s4014_s16  ;;  %v596_v28 = vpop.xlane.xlu1 %595 }
 0x368   :  { %v616_v31 = vsub.f32 %v326_v3, %v596_v28 }
 0x369   :  { %v593_v26 = vpop.xlane.xlu0 %592 }
 0x36a   :  { %v615_v27 = vsub.f32 %v321_v5, %v593_v26  ;;  %v625_v34 = vmul.f32 1.442695, %v616_v31 }
 0x36b   :  { %766 = vrot.lane.b32.xlu1 %v4165_v53, %s4014_s16 }
 0x36c   :  { %681 = vrot.lane.b32.xlu0 %v4133_v47, %s4014_s16  ;;  %v623_v33 = vmul.f32 1.442695, %v615_v27 }
 0x36e   :  { %3829 = vpow2.f32 %v623_v33 }
 0x36f   :  { %853 = vrot.lane.b32.xlu1 %v4163_v52, %s4014_s16  ;;  %3831 = vpow2.f32 %v625_v34 }
 0x370   :  { %855 = vrot.lane.b32.xlu0 %v4155_v50, %s4014_s16 }
 0x37b   :  { %v4241_v35 = vpop.eup %3829 }
 0x37c   :  { %v639_v36 = vsel %vm590_vm2, %v4241_v35, 0.0  ;;  %v4245_v37 = vpop.eup %3831 }
 0x37d   :  { %v642_v38 = vsel %vm590_vm2, %v4245_v37, 0.0 }
 0x38f   :  { %640 = vadd.xlane.f32.xlu0 %v639_v36 }
 0x393   :  { %643 = vadd.xlane.f32.xlu1 %v642_v38 }
 0x3d2   :  { %v608_v39 = vpop.xlane.xlu1 %607 }
 0x3d3   :  { %v620_v40 = vsub.f32 %v500_v10, %v608_v39  ;;  %v602_v41 = vpop.xlane.xlu0 %601 }
 0x3d4   :  { %v618_v43 = vsub.f32 %v413_v11, %v602_v41 }
 0x3d5   :  { %v633_v45 = vmul.f32 1.442695, %v620_v40 }
 0x3d6   :  { %v629_v46 = vmul.f32 1.442695, %v618_v43 }
 0x3d7   :  { %v599_v47 = vpop.xlane.xlu0 %598 }
 0x3d8   :  { %3833 = vpow2.f32 %v629_v46  ;;  %v617_v48 = vsub.f32 %v408_v14, %v599_v47  ;;  %v1028_v47 = vld [vmem:[%s4673_s5 + $0x8] sm:$0xff] }
 0x3d9   :  { %3835 = vpow2.f32 %v633_v45 }
 0x3da   :  { %v627_v49 = vmul.f32 1.442695, %v617_v48  ;;  %v1029_v48 = vld [vmem:[%s4673_s5 + $0x10] sm:$0xff] }
 0x3db   :  { %v614_v50 = vpop.xlane.xlu1 %613  ;;  %v605_v51 = vpop.xlane.xlu0 %604 }
 0x3dc   :  { %3837 = vpow2.f32 %v627_v49  ;;  %v622_v52 = vsub.f32 %v587_v20, %v614_v50  ;;  %v619_v53 = vsub.f32 %v495_v17, %v605_v51  ;;  %v1030_v49 = vld [vmem:[%s4673_s5 + $0x18] sm:$0xff] }
 0x3de   :  { %v637_v54 = vmul.f32 1.442695, %v622_v52  ;;  %v631_v56 = vmul.f32 1.442695, %v619_v53 }
 0x3df   :  { %v680_v58 = vpop.permute.xlu1 %679  ;;  %v611_v59 = vpop.xlane.xlu0 %610 }
 0x3e0   :  { %3839 = vpow2.f32 %v637_v54  ;;  %v621_v60 = vsub.f32 %v582_v22, %v611_v59 }
 0x3e1   :  { %3841 = vpow2.f32 %v631_v56 }
 0x3e2   :  { %v635_v61 = vmul.f32 1.442695, %v621_v60 }
 0x3e3   :  { %v769_v62 = vpop.permute.xlu1 %768  ;;  %v682_v63 = vpop.permute.xlu0 %681 }
 0x3e4   :  { %3843 = vpow2.f32 %v635_v61  ;;  %3606 = vmatprep.subr.mxu1 %v682_v63 }
 0x3e5   :  { %v4249_v1 = vpop.eup %3833  ;;  %3607 = vmatpush3.msra.mxu1 %v682_v63 }
 0x3e6   :  { %3608 = vmatprep.subr.mxu1 %v680_v58  ;;  %v648_v3 = vsel %vm590_vm2, %v4249_v1, 0.0  ;;  %v4253_v4 = vpop.eup %3835 }
 0x3e7   :  { %v767_v5 = vpop.permute.xlu1 %766  ;;  %649 = vadd.xlane.f32.xlu1 %v648_v3  ;;  %3609 = vmatpush3.msra.mxu1 %v680_v58  ;;  %v856_v6 = vpop.permute.xlu0 %855  ;;  %v654_v8 = vsel %vm590_vm2, %v4253_v4, 0.0 }
 0x3e8   :  { %3613 = vmatprep.subr.mxu1 %v769_v62  ;;  %3620 = vmatprep.subr.mxu0 %v856_v6 }
 0x3e9   :  { %v3838_v7 = vpop.eup %3837  ;;  %3621 = vmatpush3.msra.mxu0 %v856_v6 }
 0x3ea   :  { %v645_v9 = vsel %vm590_vm2, %v3838_v7, 0.0 }
 0x3eb   :  { %v854_v10 = vpop.permute.xlu1 %853  ;;  %655 = vadd.xlane.f32.xlu1 %v654_v8  ;;  %646 = vadd.xlane.f32.xlu0 %v645_v9 }
 0x3ec   :  { %3622 = vmatprep.subr.mxu0 %v854_v10 }
 0x3ed   :  { %v3840_v11 = vpop.eup %3839  ;;  %3623 = vmatpush3.msra.mxu0 %v854_v10 }
 0x3ee   :  { %v3842_v12 = vpop.eup %3841  ;;  %v660_v13 = vsel %vm590_vm2, %v3840_v11, 0.0 }
 0x3ef   :  { %661 = vadd.xlane.f32.xlu1 %v660_v13  ;;  %v651_v14 = vsel %vm590_vm2, %v3842_v12, 0.0 }
 0x3f0   :  { %652 = vadd.xlane.f32.xlu0 %v651_v14 }
 0x3f1   :  { %v3844_v15 = vpop.eup %3843 }
 0x3f2   :  { %v657_v16 = vsel %vm590_vm2, %v3844_v15, 0.0 }
 0x3f4   :  { %658 = vadd.xlane.f32.xlu0 %v657_v16 }
 0x400   :  { %940 = vrot.lane.b32.xlu1 %v4179_v57, %s4014_s16 }
 0x40a   :  { %942 = vrot.lane.b32.xlu0 %v4173_v55, %s4014_s16  ;;  %v1027_v55 = vld [vmem:[%s4673_s5] sm:$0xff] }
 0x40b   :  { %3634 = vmatprep.subr.mxu0 %v1027_v55 }
 0x418   :  { %v641_v17 = vpop.xlane.xlu0 %640 }
 0x419   :  { %3845 = vrcp.f32 %v641_v17 }
 0x41c   :  { %v644_v18 = vpop.xlane.xlu1 %643 }
 0x41d   :  { %3847 = vrcp.f32 %v644_v18 }
 0x426   :  { %v3846_v19 = vpop.eup %3845 }
 0x427   :  { %v671_v20 = vmul.f32 %v3846_v19, %v4241_v35 }
 0x429   :  { %3610 = vmatprep.mubr.msk.f32.mxu1 %vm590_vm2, %v671_v20 }
 0x42a   :  { %v3848_v21 = vpop.eup %3847 }
 0x42b   :  { %v672_v22 = vmul.f32 %v3848_v21, %v4245_v37 }
 0x42d   :  { %3611 = vmatmul.mubr.msk.f32.vlgmr.msra.gmra.mxu1 %vm590_vm2, %v672_v22 }
 0x42e   :  { %3614 = vmatpush3.msra.mxu1 %v769_v62 }
 0x42f   :  { %3615 = vmatprep.subr.mxu1 %v767_v5 }
 0x430   :  { %3616 = vmatpush3.msra.mxu1 %v767_v5 }
 0x470   :  { %v650_v57 = vpop.xlane.xlu1 %649 }
 0x471   :  { %3849 = vrcp.f32 %v650_v57 }
 0x474   :  { %v656_v23 = vpop.xlane.xlu1 %655  ;;  %v647_v24 = vpop.xlane.xlu0 %646 }
 0x475   :  { %3851 = vrcp.f32 %v647_v24 }
 0x476   :  { %3853 = vrcp.f32 %v656_v23 }
 0x478   :  { %v662_v26 = vpop.xlane.xlu1 %661 }
 0x479   :  { %v653_v25 = vpop.xlane.xlu0 %652 }
 0x47a   :  { %3855 = vrcp.f32 %v653_v25 }
 0x47b   :  { %3857 = vrcp.f32 %v662_v26 }
 0x47c   :  { %v941_v38 = vpop.permute.xlu1 %940 }
 0x47d   :  { %v659_v27 = vpop.xlane.xlu0 %658 }
 0x47e   :  { %3859 = vrcp.f32 %v659_v27  ;;  %v3850_v31 = vpop.eup %3849 }
 0x47f   :  { %v674_v35 = vmul.f32 %v3850_v31, %v4249_v1 }
 0x481   :  { %v943_v28 = vpop.permute.xlu0 %942 }
 0x482   :  { %3627 = vmatprep.subr.mxu1 %v943_v28  ;;  %v3852_v33 = vpop.eup %3851 }
 0x483   :  { %v673_v34 = vmul.f32 %v3852_v33, %v3838_v7  ;;  %v3854_v36 = vpop.eup %3853  ;;  %v4304_v7 = vld [vmem:[%s4674_s6] sm:$0x3f]  ;;  %v1422_v33 = vld [vmem:[%s4675_s7 + $0x8] sm:$0xff] }
 0x484   :  { %v676_v40 = vmul.f32 %v3854_v36, %v4253_v4 }
 0x485   :  { %3617 = vmatprep.mubr.msk.f32.mxu1 %vm590_vm2, %v673_v34  ;;  %v1421_v34 = vld [vmem:[%s4675_s7] sm:$0xff] }
 0x486   :  { %3618 = vmatmul.mubr.msk.f32.vlgmr.msra.gmra.mxu1 %vm590_vm2, %v674_v35 }
 0x487   :  { %v3856_v37 = vpop.eup %3855  ;;  %3628 = vmatpush3.msra.mxu1 %v943_v28 }
 0x488   :  { %v675_v39 = vmul.f32 %v3856_v37, %v3842_v12  ;;  %3629 = vmatprep.subr.mxu1 %v941_v38  ;;  %v3858_v41 = vpop.eup %3857 }
 0x489   :  { %3630 = vmatpush3.msra.mxu1 %v941_v38  ;;  %v678_v46 = vmul.f32 %v3858_v41, %v3840_v11 }
 0x48a   :  { %3624 = vmatprep.mubr.msk.f32.mxu0 %vm590_vm2, %v675_v39  ;;  %3639 = vmatprep.subr.mxu1 %v1028_v47 }
 0x48b   :  { %v3860_v43 = vpop.eup %3859  ;;  %3625 = vmatmul.mubr.msk.f32.vlgmr.msra.gmra.mxu0 %vm590_vm2, %v676_v40 }
 0x48c   :  { %v677_v45 = vmul.f32 %v3860_v43, %v3844_v15  ;;  %3635 = vmatpush3.msra.mxu0 %v1027_v55  ;;  %v1372_v15 = vrot.slane %v4304_v7, %v4115_v30 }
 0x48d   :  { %3644 = vmatprep.subr.mxu0 %v1029_v48 }
 0x48e   :  { %3631 = vmatprep.mubr.msk.f32.mxu1 %vm590_vm2, %v677_v45 }
 0x48f   :  { %3632 = vmatmul.mubr.msk.f32.vlgmr.msra.gmra.mxu1 %vm590_vm2, %v678_v46 }
 0x490   :  { %3640 = vmatpush3.msra.mxu1 %v1028_v47 }
 0x491   :  { %3649 = vmatprep.subr.mxu1 %v1030_v49 }
 0x4ed   :  { %v3612_v50 = vpop.f32.mrf.mxu1 }
 0x4ef   :  { %v757_v51 = vpop.f32.mrf.mxu1 }
 0x4f0   :  { %3636 = vmatprep.mubr.msk.f32.mxu0 %vm245_vm1, %v757_v51 }
 0x4f1   :  { %3637 = vmatmul.mubr.msk.f32.vlgmr.msra.gmra.mxu0 %vm245_vm1, %v3612_v50 }
 0x4f2   :  { %3645 = vmatpush3.msra.mxu0 %v1029_v48 }
 0x546   :  { %v3619_v52 = vpop.f32.mrf.mxu1 }
 0x548   :  { %v844_v53 = vpop.f32.mrf.mxu1 }
 0x549   :  { %3641 = vmatprep.mubr.msk.f32.mxu1 %vm245_vm1, %v844_v53  ;;  %v1417_v53 = vsub.s32 2, %v4112_v29 }
 0x54a   :  { %3642 = vmatmul.mubr.msk.f32.vlgmr.msra.gmra.mxu1 %vm245_vm1, %v3619_v52 }
 0x54b   :  { %v3626_v54 = vpop.f32.mrf.mxu0  ;;  %3650 = vmatpush3.msra.mxu1 %v1030_v49 }
 0x54d   :  { %v931_v56 = vpop.f32.mrf.mxu0 }
 0x54e   :  { %3646 = vmatprep.mubr.msk.f32.mxu0 %vm245_vm1, %v931_v56  ;;  %v1412_v56 = vrot.slane %v4304_v7, %v4121_v32 }
 0x54f   :  { %v3633_v58 = vpop.f32.mrf.mxu1  ;;  %3647 = vmatmul.mubr.msk.f32.vlgmr.msra.gmra.mxu0 %vm245_vm1, %v3626_v54 }
 0x551   :  { %v1018_v59 = vpop.f32.mrf.mxu1 }
 0x552   :  { %3651 = vmatprep.mubr.msk.f32.mxu1 %vm245_vm1, %v1018_v59 }
 0x553   :  { %3652 = vmatmul.mubr.msk.f32.vlgmr.msra.gmra.mxu1 %vm245_vm1, %v3633_v58 }
 0x5b1   :  { %v3638_v60 = vpop.f32.mrf.mxu0 }
 0x5b2   :  { %v1362_v4 = vsel %vm86_vm0, %v3638_v60, 0.0  ;;  %v1418_v60 = vrot.slane %v4304_v7, %v1417_v53 }
 0x5b3   :  { %v1103_v62 = vpop.f32.mrf.mxu0 }
 0x5b4   :  { %v1355_v10 = vsel %vm86_vm0, %v1103_v62, 0.0 }
 0x60a   :  { %v3643_v61 = vpop.f32.mrf.mxu1 }
 0x60b   :  { %v1363_v1 = vsel %vm86_vm0, %v3643_v61, 0.0 }
 0x60c   :  { %v1184_v63 = vpop.f32.mrf.mxu1  ;;  %v1364_v8 = vadd.f32 %v1363_v1, %v1362_v4 }
 0x60d   :  { %v1356_v5 = vsel %vm86_vm0, %v1184_v63, 0.0 }
 0x60e   :  { %v1357_v12 = vadd.f32 %v1356_v5, %v1355_v10  ;;  %v1535_v10 = vld [vmem:[%s4677_s9 + $0x20] sm:$0xff] }
 0x60f   :  { %v3648_v3 = vpop.f32.mrf.mxu0 }
 0x610   :  { %v1365_v6 = vsel %vm86_vm0, %v3648_v3, 0.0 }
 0x611   :  { %v1265_v9 = vpop.f32.mrf.mxu0  ;;  %v1366_v13 = vadd.f32 %v1365_v6, %v1364_v8  ;;  %v1538_v6 = vld [vmem:[%s4677_s9 + $0x38] sm:$0xff]  ;;  %v1537_v8 = vld [vmem:[%s4677_s9 + $0x30] sm:$0xff] }
 0x612   :  { %v1358_v11 = vsel %vm86_vm0, %v1265_v9, 0.0  ;;  %3665 = vmatprep.subr.mxu1 %v1538_v6  ;;  %v1536_v9 = vld [vmem:[%s4677_s9 + $0x28] sm:$0xff] }
 0x613   :  { %v3653_v14 = vpop.f32.mrf.mxu1  ;;  %v1359_v17 = vadd.f32 %v1358_v11, %v1357_v12  ;;  %3666 = vmatpush3.msra.mxu1 %v1538_v6  ;;  %v1534_v11 = vld [vmem:[%s4677_s9 + $0x18] sm:$0xff]  ;;  %v1533_v12 = vld [vmem:[%s4677_s9 + $0x10] sm:$0xff] }
 0x614   :  { %v1367_v16 = vsel %vm86_vm0, %v3653_v14, 0.0  ;;  %3667 = vmatprep.subr.mxu1 %v1537_v8  ;;  %v1531_v14 = vld [vmem:[%s4677_s9] sm:$0xff] }
 0x615   :  { %v1368_v18 = vadd.f32 %v1367_v16, %v1366_v13  ;;  %v1346_v19 = vpop.f32.mrf.mxu1  ;;  %3668 = vmatpush3.msra.mxu1 %v1537_v8  ;;  %v1532_v13 = vld [vmem:[%s4677_s9 + $0x8] sm:$0xff] }
 0x616   :  { %v1360_v20 = vsel %vm86_vm0, %v1346_v19, 0.0  ;;  %3669 = vmatprep.subr.mxu1 %v1536_v9 }
 0x617   :  { %v1374_v21 = vadd.f32 %v1372_v15, %v1368_v18  ;;  %v1361_v22 = vadd.f32 %v1360_v20, %v1359_v17  ;;  %3670 = vmatpush3.msra.mxu1 %v1536_v9 }
 0x618   :  { %3671 = vmatprep.subr.mxu1 %v1535_v10 }
 0x619   :  { %v1373_v55 = vadd.f32 %v1372_v15, %v1361_v22  ;;  %v1376_v57 = vadd.f32 %v1374_v21, %v4129_v44  ;;  %v1424_v44 = vld [vmem:[%s4675_s7 + $0x18] sm:$0xff]  ;;  %3672 = vmatpush3.msra.mxu1 %v1535_v10  ;;  %v3359_v15 = vld [vmem:[%s4676_s8] ss:$0 sm:$0xff] }
 0x61a   :  { %3654 = vmatprep.subr.mxu0 %v1424_v44  ;;  %3673 = vmatprep.subr.mxu1 %v1534_v11 }
 0x61b   :  { %v1380_v23 = vsel %vm86_vm0, %v1376_v57, 0.0  ;;  %v1375_v24 = vadd.f32 %v1373_v55, %v4125_v42  ;;  %v1386_v28 = vmul.f32 %v1376_v57, %v1376_v57  ;;  %v1423_v42 = vld [vmem:[%s4675_s7 + $0x10] sm:$0xff]  ;;  %3655 = vmatpush3.msra.mxu0 %v1424_v44  ;;  %3674 = vmatpush3.msra.mxu1 %v1534_v11 }
 0x61c   :  { %1381 = vadd.xlane.f32.xlu1 %v1380_v23  ;;  %3656 = vmatprep.subr.mxu0 %v1423_v42 }
 0x61d   :  { %v1377_v25 = vsel %vm86_vm0, %v1375_v24, 0.0  ;;  %v1385_v26 = vmul.f32 %v1375_v24, %v1375_v24  ;;  %v1390_v31 = vsel %vm86_vm0, %v1386_v28, 0.0  ;;  %3657 = vmatpush3.msra.mxu0 %v1423_v42  ;;  %3675 = vmatprep.subr.mxu1 %v1533_v12 }
 0x61e   :  { %1378 = vadd.xlane.f32.xlu0 %v1377_v25  ;;  %3658 = vmatprep.subr.mxu0 %v1422_v33 }
 0x61f   :  { %v1387_v27 = vsel %vm86_vm0, %v1385_v26, 0.0  ;;  %3659 = vmatpush3.msra.mxu0 %v1422_v33  ;;  %3676 = vmatpush3.msra.mxu1 %v1533_v12 }
 0x620   :  { %3660 = vmatprep.subr.mxu0 %v1421_v34  ;;  %3677 = vmatprep.subr.mxu1 %v1532_v13 }
 0x621   :  { %3661 = vmatpush3.msra.mxu0 %v1421_v34  ;;  %3678 = vmatpush3.msra.mxu1 %v1532_v13 }
 0x622   :  { %1388 = vadd.xlane.f32.xlu0 %v1387_v27  ;;  %3679 = vmatprep.subr.mxu1 %v1531_v14 }
 0x623   :  { %3680 = vmatpush3.msra.mxu1 %v1531_v14 }
 0x626   :  { %1391 = vadd.xlane.f32.xlu0 %v1390_v31 }
 0x6a5   :  { %v1382_v37 = vpop.xlane.xlu1 %1381 }
 0x6a6   :  { %v1384_v39 = vmul.f32 0.03125, %v1382_v37  ;;  %v1541_v37 = vsub.s32 3, %v4112_v29 }
 0x6a7   :  { %v1379_v35 = vpop.xlane.xlu0 %1378 }
 0x6a8   :  { %v1383_v36 = vmul.f32 0.03125, %v1379_v35  ;;  %v1396_v46 = vmul.f32 %v1384_v39, %v1384_v39  ;;  %v1402_v61 = vsub.f32 %v1376_v57, %v1384_v39 }
 0x6aa   :  { %v1395_v40 = vmul.f32 %v1383_v36, %v1383_v36  ;;  %v1401_v54 = vsub.f32 %v1375_v24, %v1383_v36 }
 0x6ab   :  { %v1389_v38 = vpop.xlane.xlu0 %1388 }
 0x6ac   :  { %v1393_v41 = vmul.f32 0.03125, %v1389_v38  ;;  %v1542_v38 = vrot.slane %v4304_v7, %v1541_v37 }
 0x6ae   :  { %v1397_v43 = vsub.f32 %v1393_v41, %v1395_v40 }
 0x6af   :  { %v1392_v45 = vpop.xlane.xlu0 %1391 }
 0x6b0   :  { %v1399_v47 = vmax.f32 %v1397_v43, 0.0  ;;  %v1394_v48 = vmul.f32 0.03125, %v1392_v45 }
 0x6b2   :  { %v1403_v49 = vadd.f32 1e-12, %v1399_v47  ;;  %v1398_v50 = vsub.f32 %v1394_v48, %v1396_v46 }
 0x6b4   :  { %3861 = vrsqrt.f32 %v1403_v49  ;;  %v1400_v51 = vmax.f32 %v1398_v50, 0.0 }
 0x6b6   :  { %v1404_v52 = vadd.f32 1e-12, %v1400_v51 }
 0x6b8   :  { %3863 = vrsqrt.f32 %v1404_v52 }
 0x6c1   :  { %v3862_v58 = vpop.eup %3861 }
 0x6c2   :  { %v1407_v59 = vmul.f32 %v3862_v58, %v1401_v54  ;;  %v3368_v54 = vld [vmem:[%s4671_s3 + $0x38] sm:$0xff]  ;;  %v3366_v58 = vld [vmem:[%s4671_s3 + $0x28] sm:$0xff] }
 0x6c3   :  { %3684 = vmatprep.subr.mxu0 %v3368_v54 }
 0x6c4   :  { %v1413_v62 = vmul.f32 %v1412_v56, %v1407_v59  ;;  %v3365_v59 = vld [vmem:[%s4671_s3 + $0x20] sm:$0xff] }
 0x6c5   :  { %v3864_v63 = vpop.eup %3863 }
 0x6c6   :  { %v1408_v1 = vmul.f32 %v3864_v63, %v1402_v61  ;;  %v4336_v3 = vadd.f32 %v1418_v60, %v1413_v62 }
 0x6c8   :  { %v1414_v4 = vmul.f32 %v1412_v56, %v1408_v1  ;;  %3662 = vmatprep.mubr.msk.f32.mxu0 %vm86_vm0, %v4336_v3  ;;  %v3367_v56 = vld [vmem:[%s4671_s3 + $0x30] sm:$0xff] }
 0x6ca   :  { %v1420_v5 = vadd.f32 %v1418_v60, %v1414_v4 }
 0x6cc   :  { %3663 = vmatmul.mubr.msk.f32.vlgmr.msra.gmra.mxu0 %vm86_vm0, %v1420_v5 }
 0x6cd   :  { %3685 = vmatpush3.msra.mxu0 %v3368_v54 }
 0x6ce   :  { %3686 = vmatprep.subr.mxu0 %v3367_v56 }
 0x6cf   :  { %3687 = vmatpush3.msra.mxu0 %v3367_v56 }
 0x6d0   :  { %3688 = vmatprep.subr.mxu0 %v3366_v58 }
 0x6d1   :  { %3689 = vmatpush3.msra.mxu0 %v3366_v58 }
 0x6d2   :  { %3690 = vmatprep.subr.mxu0 %v3365_v59 }
 0x6d3   :  { %3691 = vmatpush3.msra.mxu0 %v3365_v59 }
 0x78c   :  { %v3664_v16 = vpop.f32.mrf.mxu0 }
 0x78d   :  { %v1510_v17 = vadd.f32 %v3664_v16, %v3359_v15 }
 0x78e   :  { %v1504_v18 = vpop.f32.mrf.mxu0 }
 0x78f   :  { %v1516_v19 = vmul.f32 0.044715, %v1510_v17  ;;  %v1505_v20 = vadd.f32 %v3359_v15, %v1504_v18  ;;  %v1514_v34 = vmul.f32 0.5, %v1510_v17  ;;  %v1661_v15 = vsub.s32 4, %v4112_v29 }
 0x791   :  { %v1518_v21 = vmul.f32 %v1516_v19, %v1510_v17  ;;  %v1515_v22 = vmul.f32 0.044715, %v1505_v20  ;;  %v1513_v42 = vmul.f32 0.5, %v1505_v20  ;;  %v1662_v18 = vrot.slane %v4304_v7, %v1661_v15 }
 0x792   :  { %v1667_v19 = vsub.s32 5, %v4112_v29 }
 0x793   :  { %v1520_v55 = vmul.f32 %v1518_v21, %v1510_v17  ;;  %v1517_v57 = vmul.f32 %v1515_v22, %v1505_v20 }
 0x795   :  { %v1522_v23 = vadd.f32 %v1520_v55, %v1510_v17  ;;  %v1519_v24 = vmul.f32 %v1517_v57, %v1505_v20 }
 0x797   :  { %v1524_v25 = vmul.f32 0.7978846, %v1522_v23  ;;  %v1521_v26 = vadd.f32 %v1519_v24, %v1505_v20  ;;  %v1668_v23 = vrot.slane %v4304_v7, %v1667_v19 }
 0x799   :  { %3865 = vtanh.f32 %v1524_v25  ;;  %v1523_v27 = vmul.f32 0.7978846, %v1521_v26 }
 0x79b   :  { %3867 = vtanh.f32 %v1523_v27  ;;  %v3369_v27 = vld [vmem:[#allocation7 + $0x1] ss:$0 sm:$0xff] }
 0x7a6   :  { %v3866_v28 = vpop.eup %3865 }
 0x7a7   :  { %v1528_v44 = vadd.f32 1.0, %v3866_v28 }
 0x7a8   :  { %v3868_v31 = vpop.eup %3867 }
 0x7a9   :  { %v1527_v33 = vadd.f32 1.0, %v3868_v31  ;;  %v1530_v36 = vmul.f32 %v1528_v44, %v1514_v34 }
 0x7ab   :  { %v1529_v35 = vmul.f32 %v1527_v33, %v1513_v42 }
 0x7ad   :  { %3681 = vmatprep.mubr.msk.f32.mxu1 %vm1543_vm3, %v1529_v35 }
 0x7ae   :  { %3682 = vmatmul.mubr.msk.f32.vlgmr.msra.gmra.mxu1 %vm1543_vm3, %v1530_v36 }
 0x86e   :  { %v3683_v39 = vpop.f32.mrf.mxu1 }
 0x86f   :  { %v1622_v40 = vadd.f32 %v3683_v39, %v1542_v38 }
 0x870   :  { %v1616_v41 = vpop.f32.mrf.mxu1 }
 0x871   :  { %v1626_v43 = vadd.f32 %v1622_v40, %v1420_v5  ;;  %v1617_v45 = vadd.f32 %v1616_v41, %v1542_v38 }
 0x873   :  { %v1625_v46 = vadd.f32 %v1617_v45, %v4336_v3  ;;  %v1630_v47 = vsel %vm86_vm0, %v1626_v43, 0.0  ;;  %v1636_v48 = vmul.f32 %v1626_v43, %v1626_v43 }
 0x874   :  { %1631 = vadd.xlane.f32.xlu1 %v1630_v47 }
 0x875   :  { %v1627_v49 = vsel %vm86_vm0, %v1625_v46, 0.0  ;;  %v1635_v50 = vmul.f32 %v1625_v46, %v1625_v46  ;;  %v1640_v51 = vsel %vm86_vm0, %v1636_v48, 0.0 }
 0x876   :  { %1628 = vadd.xlane.f32.xlu0 %v1627_v49 }
 0x877   :  { %v1637_v52 = vsel %vm86_vm0, %v1635_v50, 0.0 }
 0x878   :  { %1641 = vadd.xlane.f32.xlu1 %v1640_v51 }
 0x87a   :  { %1638 = vadd.xlane.f32.xlu0 %v1637_v52 }
 0x8fd   :  { %v1632_v60 = vpop.xlane.xlu1 %1631 }
 0x8fe   :  { %v1634_v61 = vmul.f32 0.03125, %v1632_v60 }
 0x8ff   :  { %v1629_v62 = vpop.xlane.xlu0 %1628 }
 0x900   :  { %v1633_v63 = vmul.f32 0.03125, %v1629_v62  ;;  %v1646_v3 = vmul.f32 %v1634_v61, %v1634_v61  ;;  %v1652_v16 = vsub.f32 %v1626_v43, %v1634_v61 }
 0x901   :  { %v1642_v1 = vpop.xlane.xlu1 %1641 }
 0x902   :  { %v1644_v4 = vmul.f32 0.03125, %v1642_v1  ;;  %v1645_v6 = vmul.f32 %v1633_v63, %v1633_v63  ;;  %v1651_v20 = vsub.f32 %v1625_v46, %v1633_v63 }
 0x903   :  { %v1639_v5 = vpop.xlane.xlu0 %1638 }
 0x904   :  { %v1648_v8 = vsub.f32 %v1644_v4, %v1646_v3  ;;  %v1643_v9 = vmul.f32 0.03125, %v1639_v5 }
 0x906   :  { %v1650_v10 = vmax.f32 %v1648_v8, 0.0  ;;  %v1647_v11 = vsub.f32 %v1643_v9, %v1645_v6 }
 0x908   :  { %v1654_v12 = vadd.f32 1e-12, %v1650_v10  ;;  %v1649_v13 = vmax.f32 %v1647_v11, 0.0 }
 0x90a   :  { %3869 = vrsqrt.f32 %v1654_v12  ;;  %v1653_v14 = vadd.f32 1e-12, %v1649_v13 }
 0x90c   :  { %3871 = vrsqrt.f32 %v1653_v14 }
 0x917   :  { %v3870_v17 = vpop.eup %3869 }
 0x918   :  { %v1658_v21 = vmul.f32 %v3870_v17, %v1652_v16 }
 0x919   :  { %v3872_v22 = vpop.eup %3871 }
 0x91a   :  { %v1657_v55 = vmul.f32 %v3872_v22, %v1651_v20  ;;  %v1664_v57 = vmul.f32 %v1662_v18, %v1658_v21 }
 0x91c   :  { %v1663_v24 = vmul.f32 %v1662_v18, %v1657_v55  ;;  %v4401_v26 = vadd.f32 %v1668_v23, %v1664_v57 }
 0x91e   :  { %v4399_v25 = vadd.f32 %v1668_v23, %v1663_v24 }
 0x920   :  { %3692 = vmatprep.mubr.msk.f32.mxu0 %vm86_vm0, %v4399_v25 }
 0x921   :  { %3693 = vmatmul.mubr.msk.f32.vlgmr.msra.gmra.mxu0 %vm86_vm0, %v4401_v26 }
 0x9e1   :  { %v3694_v28 = vpop.f32.mrf.mxu0 }
 0x9e2   :  { %v4407_v31 = vadd.f32 %v3694_v28, %v3369_v27 }
 0x9e3   :  { %v1758_v44 = vpop.f32.mrf.mxu0 }
 0x9e4   :  { %v4409_v42 = vadd.f32 %v3369_v27, %v1758_v44  ;;  %1775 = vrot.lane.b32.xlu1 %v4407_v31, %s4010_s2  ;;  %1771 = vrot.lane.b32.xlu0 %v4407_v31, %s4011_s13 }
 0x9e6   :  { %3699 = vmatprep.mubr.msk.f32.mxu0 %vm245_vm1, %v4409_v42 }
 0x9e8   :  { %1773 = vrot.lane.b32.xlu0 %v4409_v42, %s4010_s2  ;;  %1769 = vrot.lane.b32.xlu1 %v4409_v42, %s4011_s13 }
 0x9ec   :  { %1783 = vrot.lane.b32.xlu0 %v4407_v31, %s4012_s14  ;;  %1779 = vrot.lane.b32.xlu1 %v4407_v31, %s4013_s15 }
 0x9f0   :  { %1781 = vrot.lane.b32.xlu0 %v4409_v42, %s4012_s14  ;;  %1777 = vrot.lane.b32.xlu1 %v4409_v42, %s4013_s15 }
 0xa56   :  { %v4429_v7 = vpop.permute.xlu1 %1775  ;;  %v4431_v33 = vpop.permute.xlu0 %1771 }
 0xa57   :  { %1957 = vrot.lane.b32.xlu0 %v4429_v7, %s4012_s14  ;;  %1870 = vrot.lane.b32.xlu1 %v4431_v33, %s4012_s14 }
 0xa5a   :  { %v4437_v34 = vpop.permute.xlu0 %1773  ;;  %v4439_v35 = vpop.permute.xlu1 %1769 }
 0xa5b   :  { %1955 = vrot.lane.b32.xlu0 %v4437_v34, %s4012_s14  ;;  %3706 = vmatprep.mubr.msk.f32.mxu1 %vm245_vm1, %v4439_v35 }
 0xa5c   :  { %1868 = vrot.lane.b32.xlu1 %v4439_v35, %s4012_s14 }
 0xa5e   :  { %v1784_v36 = vpop.permute.xlu0 %1783  ;;  %v4447_v38 = vpop.permute.xlu1 %1779 }
 0xa5f   :  { %3695 = vmatprep.subr.msk.mxu0 %vm245_vm1, %v1784_v36 }
 0xa60   :  { %2044 = vrot.lane.b32.xlu1 %v4447_v38, %s4012_s14  ;;  %3696 = vmatpush3.xpose.msk.msra.mxu0 %vm245_vm1, %v1784_v36 }
 0xa62   :  { %v1782_v39 = vpop.permute.xlu0 %1781  ;;  %v4453_v40 = vpop.permute.xlu1 %1777 }
 0xa63   :  { %3697 = vmatprep.subr.msk.mxu0 %vm245_vm1, %v1782_v39 }
 0xa64   :  { %2042 = vrot.lane.b32.xlu1 %v4453_v40, %s4012_s14  ;;  %3698 = vmatpush3.xpose.msk.msra.mxu0 %vm245_vm1, %v1782_v39 }
 0xa67   :  { %3700 = vmatmul.mubr.msk.f32.vlgmr.msra.gmra.mxu0 %vm245_vm1, %v4407_v31 }
 0xa68   :  { %3713 = vmatprep.mubr.msk.f32.mxu0 %vm245_vm1, %v4437_v34 }
 0xac9   :  { %v1958_v41 = vpop.permute.xlu0 %1957  ;;  %v1871_v43 = vpop.permute.xlu1 %1870 }
 0xaca   :  { %3702 = vmatprep.subr.msk.mxu1 %vm245_vm1, %v1871_v43  ;;  %3709 = vmatprep.subr.msk.mxu0 %vm245_vm1, %v1958_v41 }
 0xacb   :  { %3703 = vmatpush3.xpose.msk.msra.mxu1 %vm245_vm1, %v1871_v43  ;;  %3710 = vmatpush3.xpose.msk.msra.mxu0 %vm245_vm1, %v1958_v41 }
 0xacd   :  { %v1956_v45 = vpop.permute.xlu0 %1955 }
 0xace   :  { %v1869_v46 = vpop.permute.xlu1 %1868  ;;  %3711 = vmatprep.subr.msk.mxu0 %vm245_vm1, %v1956_v45 }
 0xacf   :  { %3704 = vmatprep.subr.msk.mxu1 %vm245_vm1, %v1869_v46  ;;  %3712 = vmatpush3.xpose.msk.msra.mxu0 %vm245_vm1, %v1956_v45 }
 0xad0   :  { %3705 = vmatpush3.xpose.msk.msra.mxu1 %vm245_vm1, %v1869_v46 }
 0xad2   :  { %v2045_v47 = vpop.permute.xlu1 %2044  ;;  %3714 = vmatmul.mubr.msk.f32.vlgmr.msra.gmra.mxu0 %vm245_vm1, %v4429_v7 }
 0xad3   :  { %3707 = vmatmul.mubr.msk.f32.vlgmr.msra.gmra.mxu1 %vm245_vm1, %v4431_v33  ;;  %3716 = vmatprep.subr.msk.mxu1 %vm245_vm1, %v2045_v47 }
 0xad4   :  { %3717 = vmatpush3.xpose.msk.msra.mxu1 %vm245_vm1, %v2045_v47  ;;  %3720 = vmatprep.mubr.msk.f32.mxu1 %vm245_vm1, %v4453_v40 }
 0xad6   :  { %v2043_v48 = vpop.permute.xlu1 %2042 }
 0xad7   :  { %3718 = vmatprep.subr.msk.mxu1 %vm245_vm1, %v2043_v48 }
 0xad8   :  { %3719 = vmatpush3.xpose.msk.msra.mxu1 %vm245_vm1, %v2043_v48 }
 0xadb   :  { %3721 = vmatmul.mubr.msk.f32.vlgmr.msra.gmra.mxu1 %vm245_vm1, %v4447_v38 }
 0xb27   :  { %v3701_v49 = vpop.f32.mrf.mxu0 }
 0xb28   :  { %v1865_v50 = vadd.f32 %v3701_v49, %v4209_v0 }
 0xb29   :  { %v1859_v51 = vpop.f32.mrf.mxu0 }
 0xb2a   :  { %v1860_v52 = vadd.f32 %v1859_v51, %v4211_v2  ;;  %v2132_v54 = vsel %vm590_vm2, %v1865_v50, -inf }
 0xb2b   :  { %2133 = vmax.xlane.f32.xlu1 %v2132_v54 }
 0xb2c   :  { %v2129_v56 = vsel %vm590_vm2, %v1860_v52, -inf }
 0xb2d   :  { %2130 = vmax.xlane.f32.xlu0 %v2129_v56 }
 0xb92   :  { %v3715_v58 = vpop.f32.mrf.mxu0 }
 0xb93   :  { %v3708_v59 = vpop.f32.mrf.mxu1  ;;  %v2039_v60 = vadd.f32 %v3715_v58, %v4209_v0 }
 0xb94   :  { %v1952_v61 = vadd.f32 %v3708_v59, %v4209_v0  ;;  %v2033_v4 = vpop.f32.mrf.mxu0 }
 0xb95   :  { %v1946_v62 = vpop.f32.mrf.mxu1  ;;  %v2144_v63 = vsel %vm590_vm2, %v2039_v60, -inf  ;;  %v2034_v5 = vadd.f32 %v2033_v4, %v4211_v2 }
 0xb96   :  { %v1947_v1 = vadd.f32 %v1946_v62, %v4211_v2  ;;  %2145 = vmax.xlane.f32.xlu1 %v2144_v63  ;;  %v2138_v3 = vsel %vm590_vm2, %v1952_v61, -inf }
 0xb97   :  { %2139 = vmax.xlane.f32.xlu0 %v2138_v3  ;;  %v2141_v13 = vsel %vm590_vm2, %v2034_v5, -inf }
 0xb98   :  { %v2135_v6 = vsel %vm590_vm2, %v1947_v1, -inf }
 0xb9b   :  { %v3722_v8 = vpop.f32.mrf.mxu1  ;;  %2136 = vmax.xlane.f32.xlu0 %v2135_v6 }
 0xb9c   :  { %v2126_v9 = vadd.f32 %v3722_v8, %v4209_v0 }
 0xb9d   :  { %v2120_v10 = vpop.f32.mrf.mxu1 }
 0xb9e   :  { %v2121_v11 = vadd.f32 %v2120_v10, %v4211_v2  ;;  %v2150_v12 = vsel %vm590_vm2, %v2126_v9, -inf }
 0xb9f   :  { %2151 = vmax.xlane.f32.xlu1 %v2150_v12  ;;  %2142 = vmax.xlane.f32.xlu0 %v2141_v13 }
 0xba0   :  { %v2147_v14 = vsel %vm590_vm2, %v2121_v11, -inf }
 0xba3   :  { %2148 = vmax.xlane.f32.xlu0 %v2147_v14 }
 0xbb0   :  { %2217 = vrot.lane.b32.xlu1 %v4409_v42, %s4014_s16 }
 0xbb4   :  { %2306 = vrot.lane.b32.xlu1 %v4431_v33, %s4014_s16  ;;  %v2134_v16 = vpop.xlane.xlu1 %2133 }
 0xbb5   :  { %v2154_v17 = vsub.f32 %v1865_v50, %v2134_v16 }
 0xbb6   :  { %v2131_v0 = vpop.xlane.xlu0 %2130 }
 0xbb7   :  { %v2153_v2 = vsub.f32 %v1860_v52, %v2131_v0  ;;  %v2163_v20 = vmul.f32 1.442695, %v2154_v17 }
 0xbb8   :  { %2304 = vrot.lane.b32.xlu1 %v4439_v35, %s4014_s16 }
 0xbb9   :  { %2219 = vrot.lane.b32.xlu0 %v4407_v31, %s4014_s16  ;;  %v2161_v18 = vmul.f32 1.442695, %v2153_v2 }
 0xbbb   :  { %3873 = vpow2.f32 %v2161_v18 }
 0xbbc   :  { %2391 = vrot.lane.b32.xlu1 %v4437_v34, %s4014_s16  ;;  %3875 = vpow2.f32 %v2163_v20 }
 0xbbd   :  { %2393 = vrot.lane.b32.xlu0 %v4429_v7, %s4014_s16 }
 0xbc8   :  { %v4511_v21 = vpop.eup %3873 }
 0xbc9   :  { %v2177_v22 = vsel %vm590_vm2, %v4511_v21, 0.0  ;;  %v4515_v55 = vpop.eup %3875 }
 0xbca   :  { %v2180_v57 = vsel %vm590_vm2, %v4515_v55, 0.0 }
 0xbdc   :  { %2178 = vadd.xlane.f32.xlu0 %v2177_v22 }
 0xbe0   :  { %2181 = vadd.xlane.f32.xlu1 %v2180_v57 }
 0xc1f   :  { %v2146_v23 = vpop.xlane.xlu1 %2145 }
 0xc20   :  { %v2158_v24 = vsub.f32 %v2039_v60, %v2146_v23  ;;  %v2140_v27 = vpop.xlane.xlu0 %2139 }
 0xc21   :  { %v2156_v28 = vsub.f32 %v1952_v61, %v2140_v27 }
 0xc22   :  { %v2171_v31 = vmul.f32 1.442695, %v2158_v24 }
 0xc23   :  { %v2167_v44 = vmul.f32 1.442695, %v2156_v28 }
 0xc24   :  { %v2137_v42 = vpop.xlane.xlu0 %2136 }
 0xc25   :  { %3877 = vpow2.f32 %v2167_v44  ;;  %v2155_v7 = vsub.f32 %v1947_v1, %v2137_v42 }
 0xc26   :  { %3879 = vpow2.f32 %v2171_v31 }
 0xc27   :  { %v2165_v33 = vmul.f32 1.442695, %v2155_v7 }
 0xc28   :  { %v2152_v34 = vpop.xlane.xlu1 %2151  ;;  %v2143_v35 = vpop.xlane.xlu0 %2142 }
 0xc29   :  { %3881 = vpow2.f32 %v2165_v33  ;;  %v2160_v36 = vsub.f32 %v2126_v9, %v2152_v34  ;;  %v2157_v39 = vsub.f32 %v2034_v5, %v2143_v35  ;;  %v3397_v33 = vld [vmem:[%s4673_s5 + $0x28] sm:$0xff]  ;;  %v3398_v34 = vld [vmem:[%s4673_s5 + $0x30] sm:$0xff]  ;;  %v3399_v35 = vld [vmem:[%s4673_s5 + $0x38] sm:$0xff] }
 0xc2b   :  { %v2175_v41 = vmul.f32 1.442695, %v2160_v36  ;;  %v2169_v43 = vmul.f32 1.442695, %v2157_v39 }
 0xc2c   :  { %v2218_v45 = vpop.permute.xlu1 %2217  ;;  %v2149_v46 = vpop.xlane.xlu0 %2148 }
 0xc2d   :  { %3883 = vpow2.f32 %v2175_v41  ;;  %v2159_v47 = vsub.f32 %v2121_v11, %v2149_v46 }
 0xc2e   :  { %3885 = vpow2.f32 %v2169_v43 }
 0xc2f   :  { %v2173_v48 = vmul.f32 1.442695, %v2159_v47 }
 0xc30   :  { %v2307_v49 = vpop.permute.xlu1 %2306  ;;  %v2220_v50 = vpop.permute.xlu0 %2219 }
 0xc31   :  { %3887 = vpow2.f32 %v2173_v48  ;;  %3723 = vmatprep.subr.mxu0 %v2220_v50  ;;  %3730 = vmatprep.subr.mxu1 %v2307_v49 }
 0xc32   :  { %v3878_v51 = vpop.eup %3877  ;;  %3724 = vmatpush3.msra.mxu0 %v2220_v50  ;;  %3731 = vmatpush3.msra.mxu1 %v2307_v49 }
 0xc33   :  { %3725 = vmatprep.subr.mxu0 %v2218_v45  ;;  %v2186_v52 = vsel %vm590_vm2, %v3878_v51, 0.0  ;;  %v4520_v54 = vpop.eup %3879 }
 0xc34   :  { %v2305_v56 = vpop.permute.xlu1 %2304  ;;  %2187 = vadd.xlane.f32.xlu1 %v2186_v52  ;;  %3726 = vmatpush3.msra.mxu0 %v2218_v45  ;;  %v2394_v58 = vpop.permute.xlu0 %2393  ;;  %v2192_v60 = vsel %vm590_vm2, %v4520_v54, 0.0 }
 0xc35   :  { %3732 = vmatprep.subr.mxu1 %v2305_v56  ;;  %3737 = vmatprep.subr.mxu0 %v2394_v58 }
 0xc36   :  { %v3882_v59 = vpop.eup %3881  ;;  %3733 = vmatpush3.msra.mxu1 %v2305_v56 }
 0xc37   :  { %v2183_v61 = vsel %vm590_vm2, %v3882_v59, 0.0 }
 0xc38   :  { %2193 = vadd.xlane.f32.xlu1 %v2192_v60  ;;  %2184 = vadd.xlane.f32.xlu0 %v2183_v61  ;;  %v2392_v6 = vpop.permute.xlu1 %2391  ;;  %v4570_v61 = vld [vmem:[%s4674_s6 + $0x8] sm:$0x3f] }
 0xc3a   :  { %v3884_v62 = vpop.eup %3883 }
 0xc3b   :  { %v3886_v63 = vpop.eup %3885  ;;  %v2198_v1 = vsel %vm590_vm2, %v3884_v62, 0.0 }
 0xc3c   :  { %2199 = vadd.xlane.f32.xlu1 %v2198_v1  ;;  %v2189_v3 = vsel %vm590_vm2, %v3886_v63, 0.0 }
 0xc3d   :  { %2190 = vadd.xlane.f32.xlu0 %v2189_v3 }
 0xc3e   :  { %v3888_v4 = vpop.eup %3887 }
 0xc3f   :  { %v2195_v5 = vsel %vm590_vm2, %v3888_v4, 0.0 }
 0xc41   :  { %2196 = vadd.xlane.f32.xlu0 %v2195_v5 }
 0xc4d   :  { %2478 = vrot.lane.b32.xlu1 %v4453_v40, %s4014_s16 }
 0xc57   :  { %2480 = vrot.lane.b32.xlu0 %v4447_v38, %s4014_s16  ;;  %v3396_v38 = vld [vmem:[%s4673_s5 + $0x20] sm:$0xff] }
 0xc65   :  { %v2179_v8 = vpop.xlane.xlu0 %2178 }
 0xc66   :  { %3889 = vrcp.f32 %v2179_v8  ;;  %v2911_v8 = vrot.slane %v4570_v61, %v4115_v30 }
 0xc69   :  { %v2182_v9 = vpop.xlane.xlu1 %2181 }
 0xc6a   :  { %3891 = vrcp.f32 %v2182_v9 }
 0xc73   :  { %v3890_v10 = vpop.eup %3889 }
 0xc74   :  { %v2209_v11 = vmul.f32 %v3890_v10, %v4511_v21 }
 0xc76   :  { %3727 = vmatprep.mubr.msk.f32.mxu0 %vm590_vm2, %v2209_v11 }
 0xc77   :  { %v3892_v12 = vpop.eup %3891 }
 0xc78   :  { %v2210_v13 = vmul.f32 %v3892_v12, %v4515_v55 }
 0xc7a   :  { %3728 = vmatmul.mubr.msk.f32.vlgmr.msra.gmra.mxu0 %vm590_vm2, %v2210_v13 }
 0xc7b   :  { %3738 = vmatpush3.msra.mxu0 %v2394_v58 }
 0xc7c   :  { %3739 = vmatprep.subr.mxu0 %v2392_v6 }
 0xc7d   :  { %3740 = vmatpush3.msra.mxu0 %v2392_v6 }
 0xc7e   :  { %3751 = vmatprep.subr.mxu0 %v3396_v38 }
 0xcbd   :  { %v2188_v40 = vpop.xlane.xlu1 %2187 }
 0xcbe   :  { %3893 = vrcp.f32 %v2188_v40 }
 0xcc1   :  { %v2194_v14 = vpop.xlane.xlu1 %2193  ;;  %v2185_v0 = vpop.xlane.xlu0 %2184 }
 0xcc2   :  { %3895 = vrcp.f32 %v2185_v0 }
 0xcc3   :  { %3897 = vrcp.f32 %v2194_v14 }
 0xcc5   :  { %v2200_v16 = vpop.xlane.xlu1 %2199 }
 0xcc6   :  { %v2191_v2 = vpop.xlane.xlu0 %2190 }
 0xcc7   :  { %3899 = vrcp.f32 %v2191_v2 }
 0xcc8   :  { %3901 = vrcp.f32 %v2200_v16 }
 0xcc9   :  { %v2479_v24 = vpop.permute.xlu1 %2478 }
 0xcca   :  { %v2197_v17 = vpop.xlane.xlu0 %2196 }
 0xccb   :  { %3903 = vrcp.f32 %v2197_v17  ;;  %v3894_v20 = vpop.eup %3893 }
 0xccc   :  { %v2212_v55 = vmul.f32 %v3894_v20, %v3878_v51 }
 0xcce   :  { %v2481_v18 = vpop.permute.xlu0 %2480 }
 0xccf   :  { %3744 = vmatprep.subr.mxu1 %v2481_v18  ;;  %v3896_v21 = vpop.eup %3895 }
 0xcd0   :  { %v2211_v22 = vmul.f32 %v3896_v21, %v3882_v59  ;;  %v3898_v57 = vpop.eup %3897 }
 0xcd1   :  { %v2214_v28 = vmul.f32 %v3898_v57, %v4520_v54 }
 0xcd2   :  { %3734 = vmatprep.mubr.msk.f32.mxu1 %vm590_vm2, %v2211_v22  ;;  %v3409_v22 = vld [vmem:[%s4675_s7 + $0x28] sm:$0xff] }
 0xcd3   :  { %3735 = vmatmul.mubr.msk.f32.vlgmr.msra.gmra.mxu1 %vm590_vm2, %v2212_v55  ;;  %v3408_v55 = vld [vmem:[%s4675_s7 + $0x20] sm:$0xff] }
 0xcd4   :  { %v3900_v23 = vpop.eup %3899  ;;  %3745 = vmatpush3.msra.mxu1 %v2481_v18 }
 0xcd5   :  { %v2213_v27 = vmul.f32 %v3900_v23, %v3886_v63  ;;  %3746 = vmatprep.subr.mxu1 %v2479_v24  ;;  %v3902_v31 = vpop.eup %3901 }
 0xcd6   :  { %3747 = vmatpush3.msra.mxu1 %v2479_v24  ;;  %v2216_v7 = vmul.f32 %v3902_v31, %v3884_v62 }
 0xcd7   :  { %3741 = vmatprep.mubr.msk.f32.mxu0 %vm590_vm2, %v2213_v27  ;;  %3756 = vmatprep.subr.mxu1 %v3397_v33 }
 0xcd8   :  { %v3904_v44 = vpop.eup %3903  ;;  %3742 = vmatmul.mubr.msk.f32.vlgmr.msra.gmra.mxu0 %vm590_vm2, %v2214_v28 }
 0xcd9   :  { %v2215_v42 = vmul.f32 %v3904_v44, %v3888_v4  ;;  %3752 = vmatpush3.msra.mxu0 %v3396_v38 }
 0xcda   :  { %3761 = vmatprep.subr.mxu0 %v3398_v34 }
 0xcdb   :  { %3748 = vmatprep.mubr.msk.f32.mxu1 %vm590_vm2, %v2215_v42 }
 0xcdc   :  { %3749 = vmatmul.mubr.msk.f32.vlgmr.msra.gmra.mxu1 %vm590_vm2, %v2216_v7 }
 0xcdd   :  { %3757 = vmatpush3.msra.mxu1 %v3397_v33 }
 0xcde   :  { %3766 = vmatprep.subr.mxu1 %v3399_v35 }
 0xd3a   :  { %v3729_v36 = vpop.f32.mrf.mxu0 }
 0xd3c   :  { %v2295_v39 = vpop.f32.mrf.mxu0 }
 0xd3d   :  { %3753 = vmatprep.mubr.msk.f32.mxu0 %vm245_vm1, %v2295_v39 }
 0xd3e   :  { %3754 = vmatmul.mubr.msk.f32.vlgmr.msra.gmra.mxu0 %vm245_vm1, %v3729_v36 }
 0xd3f   :  { %3762 = vmatpush3.msra.mxu0 %v3398_v34 }
 0xd93   :  { %v3736_v41 = vpop.f32.mrf.mxu1 }
 0xd95   :  { %v2382_v43 = vpop.f32.mrf.mxu1 }
 0xd96   :  { %3758 = vmatprep.mubr.msk.f32.mxu1 %vm245_vm1, %v2382_v43 }
 0xd97   :  { %3759 = vmatmul.mubr.msk.f32.vlgmr.msra.gmra.mxu1 %vm245_vm1, %v3736_v41 }
 0xd98   :  { %v3743_v45 = vpop.f32.mrf.mxu0  ;;  %3767 = vmatpush3.msra.mxu1 %v3399_v35 }
 0xd9a   :  { %v2469_v46 = vpop.f32.mrf.mxu0 }
 0xd9b   :  { %3763 = vmatprep.mubr.msk.f32.mxu0 %vm245_vm1, %v2469_v46  ;;  %v2951_v46 = vrot.slane %v4570_v61, %v4121_v32  ;;  %v3423_v32 = vld [vmem:[%s4677_s9 + $0x78] sm:$0xff] }
 0xd9c   :  { %v3750_v47 = vpop.f32.mrf.mxu1  ;;  %3764 = vmatmul.mubr.msk.f32.vlgmr.msra.gmra.mxu0 %vm245_vm1, %v3743_v45  ;;  %3782 = vmatprep.subr.mxu1 %v3423_v32 }
 0xd9e   :  { %v2556_v48 = vpop.f32.mrf.mxu1 }
 0xd9f   :  { %3768 = vmatprep.mubr.msk.f32.mxu1 %vm245_vm1, %v2556_v48 }
 0xda0   :  { %3769 = vmatmul.mubr.msk.f32.vlgmr.msra.gmra.mxu1 %vm245_vm1, %v3750_v47 }
 0xda1   :  { %3783 = vmatpush3.msra.mxu1 %v3423_v32 }
 0xdfe   :  { %v3755_v49 = vpop.f32.mrf.mxu0 }
 0xdff   :  { %v2901_v58 = vsel %vm86_vm0, %v3755_v49, 0.0  ;;  %v2957_v49 = vrot.slane %v4570_v61, %v1417_v53  ;;  %v3421_v53 = vld [vmem:[%s4677_s9 + $0x68] sm:$0xff] }
 0xe00   :  { %v2642_v51 = vpop.f32.mrf.mxu0 }
 0xe01   :  { %v2894_v1 = vsel %vm86_vm0, %v2642_v51, 0.0 }
 0xe57   :  { %v3760_v50 = vpop.f32.mrf.mxu1 }
 0xe58   :  { %v2902_v54 = vsel %vm86_vm0, %v3760_v50, 0.0 }
 0xe59   :  { %v2723_v52 = vpop.f32.mrf.mxu1  ;;  %v2903_v62 = vadd.f32 %v2902_v54, %v2901_v58 }
 0xe5a   :  { %v2895_v59 = vsel %vm86_vm0, %v2723_v52, 0.0 }
 0xe5b   :  { %v2896_v4 = vadd.f32 %v2895_v59, %v2894_v1  ;;  %v3418_v1 = vld [vmem:[%s4677_s9 + $0x50] sm:$0xff] }
 0xe5c   :  { %v3765_v56 = vpop.f32.mrf.mxu0 }
 0xe5d   :  { %v2904_v60 = vsel %vm86_vm0, %v3765_v56, 0.0 }
 0xe5e   :  { %v2804_v63 = vpop.f32.mrf.mxu0  ;;  %v2905_v5 = vadd.f32 %v2904_v60, %v2903_v62  ;;  %v3422_v60 = vld [vmem:[%s4677_s9 + $0x70] sm:$0xff]  ;;  %v3420_v62 = vld [vmem:[%s4677_s9 + $0x60] sm:$0xff] }
 0xe5f   :  { %v2897_v3 = vsel %vm86_vm0, %v2804_v63, 0.0  ;;  %3784 = vmatprep.subr.mxu1 %v3422_v60  ;;  %v3419_v63 = vld [vmem:[%s4677_s9 + $0x58] sm:$0xff] }
 0xe60   :  { %v3770_v6 = vpop.f32.mrf.mxu1  ;;  %v2898_v10 = vadd.f32 %v2897_v3, %v2896_v4  ;;  %3785 = vmatpush3.msra.mxu1 %v3422_v60  ;;  %v3417_v3 = vld [vmem:[%s4677_s9 + $0x48] sm:$0xff]  ;;  %v3416_v4 = vld [vmem:[%s4677_s9 + $0x40] sm:$0xff] }
 0xe61   :  { %v2906_v9 = vsel %vm86_vm0, %v3770_v6, 0.0  ;;  %3786 = vmatprep.subr.mxu1 %v3421_v53 }
 0xe62   :  { %v2907_v11 = vadd.f32 %v2906_v9, %v2905_v5  ;;  %v2885_v12 = vpop.f32.mrf.mxu1  ;;  %3787 = vmatpush3.msra.mxu1 %v3421_v53  ;;  %v3413_v5 = vld [vmem:[%s4676_s8 + $0x1] ss:$0 sm:$0xff] }
 0xe63   :  { %v2899_v13 = vsel %vm86_vm0, %v2885_v12, 0.0  ;;  %3788 = vmatprep.subr.mxu1 %v3420_v62 }
 0xe64   :  { %v2913_v38 = vadd.f32 %v2911_v8, %v2907_v11  ;;  %v2900_v40 = vadd.f32 %v2899_v13, %v2898_v10  ;;  %3789 = vmatpush3.msra.mxu1 %v3420_v62 }
 0xe65   :  { %3790 = vmatprep.subr.mxu1 %v3419_v63 }
 0xe66   :  { %v2912_v14 = vadd.f32 %v2911_v8, %v2900_v40  ;;  %v2915_v0 = vadd.f32 %v2913_v38, %v4401_v26  ;;  %v3411_v26 = vld [vmem:[%s4675_s7 + $0x38] sm:$0xff]  ;;  %3791 = vmatpush3.msra.mxu1 %v3419_v63 }
 0xe67   :  { %3771 = vmatprep.subr.mxu0 %v3411_v26  ;;  %3792 = vmatprep.subr.mxu1 %v3418_v1 }
 0xe68   :  { %v2919_v2 = vsel %vm86_vm0, %v2915_v0, 0.0  ;;  %v2914_v16 = vadd.f32 %v2912_v14, %v4399_v25  ;;  %v2925_v20 = vmul.f32 %v2915_v0, %v2915_v0  ;;  %v3410_v25 = vld [vmem:[%s4675_s7 + $0x30] sm:$0xff]  ;;  %3772 = vmatpush3.msra.mxu0 %v3411_v26  ;;  %3793 = vmatpush3.msra.mxu1 %v3418_v1 }
 0xe69   :  { %2920 = vadd.xlane.f32.xlu1 %v2919_v2  ;;  %3773 = vmatprep.subr.mxu0 %v3410_v25 }
 0xe6a   :  { %v2916_v17 = vsel %vm86_vm0, %v2914_v16, 0.0  ;;  %v2924_v30 = vmul.f32 %v2914_v16, %v2914_v16  ;;  %v2929_v21 = vsel %vm86_vm0, %v2925_v20, 0.0  ;;  %3774 = vmatpush3.msra.mxu0 %v3410_v25  ;;  %3794 = vmatprep.subr.mxu1 %v3417_v3 }
 0xe6b   :  { %2917 = vadd.xlane.f32.xlu0 %v2916_v17  ;;  %3775 = vmatprep.subr.mxu0 %v3409_v22 }
 0xe6c   :  { %v2926_v18 = vsel %vm86_vm0, %v2924_v30, 0.0  ;;  %3776 = vmatpush3.msra.mxu0 %v3409_v22  ;;  %3795 = vmatpush3.msra.mxu1 %v3417_v3  ;;  %v3203_v3 = vrot.slane %v4570_v61, %v1661_v15  ;;  %v3426_v15 = vld [vmem:[%s4679_s11] ss:$0 sm:$0xff] }
 0xe6d   :  { %3777 = vmatprep.subr.mxu0 %v3408_v55  ;;  %3796 = vmatprep.subr.mxu1 %v3416_v4 }
 0xe6e   :  { %3778 = vmatpush3.msra.mxu0 %v3408_v55  ;;  %3797 = vmatpush3.msra.mxu1 %v3416_v4 }
 0xe6f   :  { %2927 = vadd.xlane.f32.xlu0 %v2926_v18 }
 0xe73   :  { %2930 = vadd.xlane.f32.xlu0 %v2929_v21 }
 0xef2   :  { %v2921_v24 = vpop.xlane.xlu1 %2920 }
 0xef3   :  { %v2923_v28 = vmul.f32 0.03125, %v2921_v24 }
 0xef4   :  { %v2918_v57 = vpop.xlane.xlu0 %2917 }
 0xef5   :  { %v2922_v23 = vmul.f32 0.03125, %v2918_v57  ;;  %v2935_v33 = vmul.f32 %v2923_v28, %v2923_v28  ;;  %v2941_v50 = vsub.f32 %v2915_v0, %v2923_v28  ;;  %v3084_v57 = vrot.slane %v4570_v61, %v1541_v37  ;;  %v3215_v37 = vld [vmem:[%s4678_s10 + $0x18] sm:$0xff] }
 0xef6   :  { %3801 = vmatprep.subr.mxu0 %v3215_v37 }
 0xef7   :  { %v2934_v31 = vmul.f32 %v2922_v23, %v2922_v23  ;;  %v2940_v45 = vsub.f32 %v2914_v16, %v2922_v23 }
 0xef8   :  { %v2928_v27 = vpop.xlane.xlu0 %2927 }
 0xef9   :  { %v2932_v44 = vmul.f32 0.03125, %v2928_v27 }
 0xefb   :  { %v2936_v42 = vsub.f32 %v2932_v44, %v2934_v31 }
 0xefc   :  { %v2931_v7 = vpop.xlane.xlu0 %2930 }
 0xefd   :  { %v2938_v34 = vmax.f32 %v2936_v42, 0.0  ;;  %v2933_v35 = vmul.f32 0.03125, %v2931_v7 }
 0xeff   :  { %v2942_v36 = vadd.f32 1e-12, %v2938_v34  ;;  %v2937_v39 = vsub.f32 %v2933_v35, %v2935_v33 }
 0xf01   :  { %3905 = vrsqrt.f32 %v2942_v36  ;;  %v2939_v41 = vmax.f32 %v2937_v39, 0.0  ;;  %v3214_v39 = vld [vmem:[%s4678_s10 + $0x10] sm:$0xff] }
 0xf03   :  { %v2943_v43 = vadd.f32 1e-12, %v2939_v41  ;;  %v3213_v41 = vld [vmem:[%s4678_s10 + $0x8] sm:$0xff] }
 0xf05   :  { %3907 = vrsqrt.f32 %v2943_v43  ;;  %v3212_v43 = vld [vmem:[%s4678_s10] sm:$0xff] }
 0xf0e   :  { %v3906_v47 = vpop.eup %3905 }
 0xf0f   :  { %v2946_v48 = vmul.f32 %v3906_v47, %v2940_v45 }
 0xf11   :  { %v2952_v51 = vmul.f32 %v2951_v46, %v2946_v48 }
 0xf12   :  { %v3908_v52 = vpop.eup %3907 }
 0xf13   :  { %v2947_v54 = vmul.f32 %v3908_v52, %v2941_v50  ;;  %v2958_v56 = vadd.f32 %v2957_v49, %v2952_v51 }
 0xf15   :  { %v2953_v58 = vmul.f32 %v2951_v46, %v2947_v54  ;;  %3779 = vmatprep.mubr.msk.f32.mxu0 %vm86_vm0, %v2958_v56 }
 0xf17   :  { %v2959_v59 = vadd.f32 %v2957_v49, %v2953_v58 }
 0xf19   :  { %3780 = vmatmul.mubr.msk.f32.vlgmr.msra.gmra.mxu0 %vm86_vm0, %v2959_v59 }
 0xf1a   :  { %3802 = vmatpush3.msra.mxu0 %v3215_v37 }
 0xf1b   :  { %3803 = vmatprep.subr.mxu0 %v3214_v39 }
 0xf1c   :  { %3804 = vmatpush3.msra.mxu0 %v3214_v39 }
 0xf1d   :  { %3805 = vmatprep.subr.mxu0 %v3213_v41 }
 0xf1e   :  { %3806 = vmatpush3.msra.mxu0 %v3213_v41 }
 0xf1f   :  { %3807 = vmatprep.subr.mxu0 %v3212_v43 }
 0xf20   :  { %3808 = vmatpush3.msra.mxu0 %v3212_v43 }
 0xfd9   :  { %v3781_v6 = vpop.f32.mrf.mxu0 }
 0xfda   :  { %v3051_v8 = vadd.f32 %v3781_v6, %v3413_v5 }
 0xfdb   :  { %v3045_v9 = vpop.f32.mrf.mxu0 }
 0xfdc   :  { %v3057_v10 = vmul.f32 0.044715, %v3051_v8  ;;  %v3046_v11 = vadd.f32 %v3413_v5, %v3045_v9  ;;  %v3055_v25 = vmul.f32 0.5, %v3051_v8 }
 0xfde   :  { %v3059_v12 = vmul.f32 %v3057_v10, %v3051_v8  ;;  %v3056_v13 = vmul.f32 0.044715, %v3046_v11  ;;  %v3054_v21 = vmul.f32 0.5, %v3046_v11  ;;  %v3209_v10 = vrot.slane %v4570_v61, %v1667_v19 }
 0xfe0   :  { %v3061_v38 = vmul.f32 %v3059_v12, %v3051_v8  ;;  %v3058_v40 = vmul.f32 %v3056_v13, %v3046_v11 }
 0xfe2   :  { %v3063_v14 = vadd.f32 %v3061_v38, %v3051_v8  ;;  %v3060_v0 = vmul.f32 %v3058_v40, %v3046_v11 }
 0xfe4   :  { %v3065_v2 = vmul.f32 0.7978846, %v3063_v14  ;;  %v3062_v16 = vadd.f32 %v3060_v0, %v3046_v11 }
 0xfe6   :  { %3909 = vtanh.f32 %v3065_v2  ;;  %v3064_v17 = vmul.f32 0.7978846, %v3062_v16 }
 0xfe8   :  { %3911 = vtanh.f32 %v3064_v17 }
 0xff3   :  { %v3910_v30 = vpop.eup %3909 }
 0xff4   :  { %v3069_v20 = vadd.f32 1.0, %v3910_v30 }
 0xff5   :  { %v3912_v18 = vpop.eup %3911 }
 0xff6   :  { %v3068_v26 = vadd.f32 1.0, %v3912_v18  ;;  %v3071_v55 = vmul.f32 %v3069_v20, %v3055_v25 }
 0xff8   :  { %v3070_v22 = vmul.f32 %v3068_v26, %v3054_v21 }
 0xffa   :  { %3798 = vmatprep.mubr.msk.f32.mxu1 %vm1543_vm3, %v3070_v22 }
 0xffb   :  { %3799 = vmatmul.mubr.msk.f32.vlgmr.msra.gmra.mxu1 %vm1543_vm3, %v3071_v55 }
0x10bb   :  { %v3800_v23 = vpop.f32.mrf.mxu1 }
0x10bc   :  { %v3163_v24 = vadd.f32 %v3800_v23, %v3084_v57 }
0x10bd   :  { %v3157_v27 = vpop.f32.mrf.mxu1 }
0x10be   :  { %v3167_v28 = vadd.f32 %v3163_v24, %v2959_v59  ;;  %v3158_v31 = vadd.f32 %v3157_v27, %v3084_v57 }
0x10c0   :  { %v3166_v44 = vadd.f32 %v3158_v31, %v2958_v56  ;;  %v3171_v42 = vsel %vm86_vm0, %v3167_v28, 0.0  ;;  %v3177_v7 = vmul.f32 %v3167_v28, %v3167_v28 }
0x10c1   :  { %3172 = vadd.xlane.f32.xlu1 %v3171_v42 }
0x10c2   :  { %v3168_v33 = vsel %vm86_vm0, %v3166_v44, 0.0  ;;  %v3176_v34 = vmul.f32 %v3166_v44, %v3166_v44  ;;  %v3181_v35 = vsel %vm86_vm0, %v3177_v7, 0.0 }
0x10c3   :  { %3169 = vadd.xlane.f32.xlu0 %v3168_v33 }
0x10c4   :  { %v3178_v36 = vsel %vm86_vm0, %v3176_v34, 0.0 }
0x10c5   :  { %3182 = vadd.xlane.f32.xlu1 %v3181_v35 }
0x10c7   :  { %3179 = vadd.xlane.f32.xlu0 %v3178_v36 }
0x114a   :  { %v3173_v45 = vpop.xlane.xlu1 %3172 }
0x114b   :  { %v3175_v46 = vmul.f32 0.03125, %v3173_v45 }
0x114c   :  { %v3170_v47 = vpop.xlane.xlu0 %3169 }
0x114d   :  { %v3174_v48 = vmul.f32 0.03125, %v3170_v47  ;;  %v3187_v50 = vmul.f32 %v3175_v46, %v3175_v46  ;;  %v3193_v63 = vsub.f32 %v3167_v28, %v3175_v46 }
0x114e   :  { %v3183_v49 = vpop.xlane.xlu1 %3182 }
0x114f   :  { %v3185_v51 = vmul.f32 0.03125, %v3183_v49  ;;  %v3186_v54 = vmul.f32 %v3174_v48, %v3174_v48  ;;  %v3192_v4 = vsub.f32 %v3166_v44, %v3174_v48 }
0x1150   :  { %v3180_v52 = vpop.xlane.xlu0 %3179 }
0x1151   :  { %v3189_v56 = vsub.f32 %v3185_v51, %v3187_v50  ;;  %v3184_v58 = vmul.f32 0.03125, %v3180_v52 }
0x1153   :  { %v3191_v59 = vmax.f32 %v3189_v56, 0.0  ;;  %v3188_v32 = vsub.f32 %v3184_v58, %v3186_v54 }
0x1155   :  { %v3195_v60 = vadd.f32 1e-12, %v3191_v59  ;;  %v3190_v53 = vmax.f32 %v3188_v32, 0.0 }
0x1157   :  { %3913 = vrsqrt.f32 %v3195_v60  ;;  %v3194_v62 = vadd.f32 1e-12, %v3190_v53 }
0x1159   :  { %3915 = vrsqrt.f32 %v3194_v62 }
0x1164   :  { %v3914_v1 = vpop.eup %3913 }
0x1165   :  { %v3199_v5 = vmul.f32 %v3914_v1, %v3193_v63 }
0x1166   :  { %v3916_v6 = vpop.eup %3915 }
0x1167   :  { %v3198_v8 = vmul.f32 %v3916_v6, %v3192_v4  ;;  %v3205_v9 = vmul.f32 %v3203_v3, %v3199_v5 }
0x1169   :  { %v3204_v11 = vmul.f32 %v3203_v3, %v3198_v8  ;;  %v3211_v13 = vadd.f32 %v3209_v10, %v3205_v9 }
0x116b   :  { %v3210_v12 = vadd.f32 %v3209_v10, %v3204_v11 }
0x116d   :  { %3809 = vmatprep.mubr.msk.f32.mxu0 %vm86_vm0, %v3210_v12 }
0x116e   :  { %3810 = vmatmul.mubr.msk.f32.vlgmr.msra.gmra.mxu0 %vm86_vm0, %v3211_v13 }
0x122e   :  { %v3811_v38 = vpop.f32.mrf.mxu0 }
0x122f   :  { %v3301_v40 = vadd.f32 %v3811_v38, %v3426_v15 }
0x1230   :  { %v3295_v14 = vpop.f32.mrf.mxu0 }
0x1231   :  { %3305 = vst [vmem:[#allocation8 + $0x8] sm:$0xff] %v3301_v40  ;;  %v3296_v29 = vadd.f32 %v3426_v15, %v3295_v14 }
0x1233   :  { %3304 = vst [vmem:[#allocation8] sm:$0xff] %v3296_v29 }
0x1234   :  { %3988 = shalt.err (!%p3985_p5)
}
0x1235   :  { %3317 = dma.vmem_to_hbm [thread:$0]  %s3312_s24, 256, %s4680_s12, [#allocation4], %s4005_s26, %s4005_s26, %s4006_s27  }
0x1236   :  { %4001 = dma.done.wait [#allocation4], 256  }
0x1237   :  { %4002 = vsyncadd [#allocation4], 4294967040 }
0x1238   :  { %3321 = vsyncpa [#allocation3], 1 }
0x1239   :  { %3322 = vsyncpa [#allocation6], 1 }
0x123a   :  { %3323 = vsyncpa [#allocation4], 1 }

</bundles_post_ra>
